<compile_context>
chip_gen: v5e
topology: v5e:2x2
jax: 0.10.0
libtpu: 0.0.40
codegen_flags: <defaults>
</compile_context>

<pallas_src>
import functools
import numpy as np
import jax
import jax.numpy as jnp
from jax.experimental import pallas as pl
from jax.experimental.pallas import tpu as pltpu


def _cdiv(a, b):
    return -(-a // b)


def _round_up(x, m):
    return ((x + m - 1) // m) * m


def _centered_fft_matrix(n):
    """Matrix A with A @ v == fftshift(fft(fftshift(v), norm='ortho')) for 1-D v."""
    eye = np.eye(n, dtype=np.complex64)
    a = np.fft.fftshift(eye, axes=0)
    a = np.fft.fft(a, axis=0, norm="ortho")
    a = np.fft.fftshift(a, axes=0)
    return a.astype(np.complex64)


def _tpu_vmem_capacity_bytes():
    """Generation-aware VMEM capacity; falls back to the smallest (v7x, 64 MiB)."""
    try:
        info = pltpu.get_tpu_info()
        return int(getattr(info, "vmem_capacity_bytes", 64 << 20))
    except Exception:
        return 64 << 20


def _choose_time_block(T, H, W, Hs, mm_bytes, step_budget):
    """Frames handled per grid step, sized from the per-generation VMEM budget."""
    hw = H * W
    # Per-frame working set: double-buffered output blocks (2 outputs, f32), the
    # f32 elementwise temps + bf16 sig copy, and the stage-1 result u (+ bf16 copy).
    per_frame = hw * (16 + 12 + mm_bytes) + H * 2 * W * (4 + mm_bytes)
    fixed = 2 * Hs * 2 * W * 4 + (64 << 10)              # stage-2 z scratch + slack
    t_rows = max(1, _cdiv(512, H))                       # stage-1 M target ~512 rows
    t_vmem = max(1, (step_budget - fixed) // max(per_frame, 1))
    t_blk = max(1, min(T, t_rows, t_vmem))
    if T >= 2:
        t_blk = min(t_blk, _cdiv(T, 2))                  # >=2 grid steps (v7x: 2 TCs)
    # Prefer a block size that divides T (no dead tail-frame work), unless that
    # would shrink the block by more than 2x.
    for cand in range(t_blk, 0, -1):
        if T % cand == 0:
            if cand * 2 >= t_blk:
                t_blk = cand
            break
    return int(max(1, t_blk))


def _dce_kernel(kt_ref, cp_ref, x_ref, r1_ref, m0t_ref, off_ref,
                arow_ref, acolT_ref, out_r_ref, out_i_ref, *,
                t_blk, n_grp, TR, R1CA, cos_fa, mm_dtype, approx_recip):
    _, H, W = x_ref.shape
    Hs = arow_ref.shape[0] // 2

    kt = kt_ref[0]                 # (t_blk, 1, 1)  per-frame K_time
    cp = cp_ref[0]                 # (t_blk, 1, 1)  per-frame Cp
    x0 = x_ref[0][None]            # (1, H, W)
    x1 = x_ref[1][None]
    r1 = r1_ref[...][None]
    m0t = m0t_ref[...][None]
    off = off_ref[...][None]       # sig_baseline - M_steady
    acolT = acolT_ref[...]         # (W, 2W)   [AcT_r | AcT_i]   (matmul dtype)
    arow = arow_ref[...]           # (2Hs, H)  [A_r ; 0 ; A_i ; 0] (matmul dtype)

    g_sz = t_blk // n_grp
    for g in range(n_grp):
        lo = g * g_sz
        # ---- DCE signal model, vectorized over the group's frames (VPU + EUP) ----
        ca = kt[lo:lo + g_sz] * x0 + cp[lo:lo + g_sz] * x1           # (g_sz, H, W)
        e1ca = jnp.exp(-TR * (r1 + R1CA * ca))
        num = m0t * (1.0 - e1ca)
        den = 1.0 - cos_fa * e1ca
        if approx_recip:
            ca_trans = num * pl.reciprocal(den, approx=True)
        else:
            ca_trans = num / den
        sig = (ca_trans + off).reshape(g_sz * H, W)                  # free leading-dim merge

        # ---- stage 1: centered DFT along W for all frames of the group
        #      (one wide MXU matmul, f32 accumulation) ----
        u = jnp.dot(sig.astype(mm_dtype), acolT,
                    preferred_element_type=jnp.float32)              # (g_sz*H, 2W)
        u16 = u.astype(mm_dtype)                                     # single downcast

        # ---- stage 2: centered DFT along H, one MXU dot per frame;
        #      real/imag are written with two direct half-width stores ----
        for t in range(g_sz):
            z = jnp.dot(arow, u16[t * H:(t + 1) * H, :],
                        preferred_element_type=jnp.float32)          # (2Hs, 2W)
            zr = z[:H, :]              # A_r @ [Ur | Ui]
            zi = z[Hs:Hs + H, :]       # A_i @ [Ur | Ui]   (sublane-aligned offset)
            out_r_ref[lo + t] = zr[:, :W] - zi[:, W:]                # Ar@Ur - Ai@Ui
            out_i_ref[lo + t] = zr[:, W:] + zi[:, :W]                # Ar@Ui + Ai@Ur


class DCE:
    def __init__(self, ishape, sample_time, sig_baseline, R1, Cp,
                 M0=5.0, R1CA=4.39, FA=15.0, TR=0.006,
                 matmul_dtype=jnp.bfloat16):
        self.ishape = list(ishape)                    # [2, 1, 1, H, W]
        self.H = int(ishape[-2])
        self.W = int(ishape[-1])
        self.Hs = _round_up(self.H, 8)                # sublane-aligned row-pad for A_row

        st = np.squeeze(np.asarray(sample_time)).astype(np.float32)
        self.T = int(st.size)
        self.sample_time = st

        self.TR = float(TR)
        self.R1CA = float(R1CA)
        self.FA_radian = float(FA) * np.pi / 180.0
        self.matmul_dtype = matmul_dtype

        cos_fa = float(np.cos(self.FA_radian))
        sin_fa = float(np.sin(self.FA_radian))

        sig_b = np.asarray(sig_baseline, np.float32).reshape(self.H, self.W)
        r1 = np.asarray(R1, np.float32).reshape(-1, self.H, self.W)[0]

        e1 = np.exp(-self.TR * r1).astype(np.float32)
        m0 = (sig_b * (1.0 - cos_fa * e1)) / (sin_fa * (1.0 - e1))
        m0_trans = (m0 * sin_fa).astype(np.float32)
        m_steady = (m0_trans * (1.0 - e1) / (1.0 - e1 * cos_fa)).astype(np.float32)

        self.sig_baseline = sig_b
        self.r1 = r1
        self.m0_trans = m0_trans
        self.m_steady = m_steady
        self.offset = (sig_b - m_steady).astype(np.float32)

        # Cp: transpose(0,1).view(-1)
        cp = np.asarray(Cp, np.float32).T.reshape(-1)
        assert cp.shape[0] == self.T
        self.Cp = cp

        # K_time = cumsum(Cp) * dt[-1]  (dt from nonzero sample times)
        t1 = st[np.nonzero(st)]
        dt_last = float(np.diff(t1)[-1])
        self.k_time = (np.cumsum(cp, dtype=np.float32) * dt_last).astype(np.float32)

        # centered-DFT matrices, stacked real/imag, stored in the matmul dtype.
        #   arow_stk: rows [0:H] = A_r, [Hs:Hs+H] = A_i (zero rows keep offsets aligned)
        a_row = _centered_fft_matrix(self.H)          # (H, H) complex
        a_colT = _centered_fft_matrix(self.W).T       # (W, W) complex
        arow_np = np.zeros((2 * self.Hs, self.H), np.float32)
        arow_np[:self.H] = a_row.real
        arow_np[self.Hs:self.Hs + self.H] = a_row.imag
        self.a_row_stk = jnp.asarray(arow_np, dtype=matmul_dtype)           # (2Hs, H)
        self.a_colT_stk = jnp.asarray(
            np.concatenate([a_colT.real, a_colT.imag], axis=1), dtype=matmul_dtype)  # (W, 2W)

        # ---- generation-aware time blocking / VMEM budget ----
        mm_bytes = np.dtype(self.matmul_dtype).itemsize
        self._vmem_cap = _tpu_vmem_capacity_bytes()
        step_budget = max(8 << 20, self._vmem_cap // 4)   # ~16 MiB v7x, ~32 MiB v5e/v6e
        self.t_blk = _choose_time_block(self.T, self.H, self.W, self.Hs,
                                        mm_bytes, step_budget)
        self.n_grp = 2 if (self.t_blk >= 4 and self.t_blk % 2 == 0) else 1
        self.g_sz = self.t_blk // self.n_grp
        self.n_blk = _cdiv(self.T, self.t_blk)

        # per-frame coefficients, padded and pre-shaped for (g,1,1) broadcasting
        t_pad = self.n_blk * self.t_blk
        kp = np.zeros((t_pad,), np.float32)
        kp[:self.T] = self.k_time
        cpd = np.zeros((t_pad,), np.float32)
        cpd[:self.T] = cp
        self._k_dev = jnp.asarray(kp.reshape(self.n_blk, self.t_blk, 1, 1))
        self._c_dev = jnp.asarray(cpd.reshape(self.n_blk, self.t_blk, 1, 1))

        # device copies of the per-pixel maps
        self._r1_dev = jnp.asarray(r1, jnp.float32)
        self._m0t_dev = jnp.asarray(m0_trans, jnp.float32)
        self._off_dev = jnp.asarray(self.offset, jnp.float32)

        self._call = None   # cached pallas_call (resolved on first forward)

    # ---------------------------------------------------------------- VMEM budget
    def _vmem_limit_bytes(self, single_buffer_invariants):
        H, W, Hs = self.H, self.W, self.Hs
        hw = H * W
        mmb = np.dtype(self.matmul_dtype).itemsize
        t_blk, g_sz = self.t_blk, self.g_sz
        inv = 5 * hw * 4 + (2 * Hs * H + W * 2 * W) * mmb
        inv *= 1 if single_buffer_invariants else 2
        coef = 2 * 2 * (t_blk * 8 * 128 * 4)             # 2 coef blocks, padded, dbl-buffered
        outs = 2 * 2 * t_blk * hw * 4                    # 2 outputs, double-buffered
        work = (g_sz * hw * (3 * 4 + mmb)
                + g_sz * H * 2 * W * (4 + mmb)
                + 2 * Hs * 2 * W * 4)
        est = inv + coef + outs + work + (1 << 20)
        limit = min(int(0.75 * self._vmem_cap), max(int(1.5 * est), 16 << 20))
        return int(max(limit, 16 << 20))

    # ----------------------------------------------------------------- pallas_call
    def _build_pallas_call(self, single_buffer_invariants):
        H, W, Hs = self.H, self.W, self.Hs
        t_blk, n_blk = self.t_blk, self.n_blk

        inv_kw = {}
        if single_buffer_invariants:
            # grid-invariant inputs: one VMEM buffer instead of the default two
            inv_kw = dict(pipeline_mode=pl.Buffered(1))

        def inv_spec(shape):
            nd = len(shape)
            return pl.BlockSpec(shape, lambda i, _nd=nd: (0,) * _nd, **inv_kw)

        kernel = functools.partial(
            _dce_kernel,
            t_blk=t_blk,
            n_grp=self.n_grp,
            TR=self.TR,
            R1CA=self.R1CA,
            cos_fa=float(np.cos(self.FA_radian)),
            mm_dtype=self.matmul_dtype,
            approx_recip=bool(np.dtype(self.matmul_dtype).itemsize < 4),
        )

        return pl.pallas_call(
            kernel,
            out_shape=(jax.ShapeDtypeStruct((n_blk * t_blk, H, W), jnp.float32),
                       jax.ShapeDtypeStruct((n_blk * t_blk, H, W), jnp.float32)),
            grid=(n_blk,),
            in_specs=[
                pl.BlockSpec((1, t_blk, 1, 1), lambda i: (i, 0, 0, 0)),   # K_time
                pl.BlockSpec((1, t_blk, 1, 1), lambda i: (i, 0, 0, 0)),   # Cp
                inv_spec((2, H, W)),                                      # x params
                inv_spec((H, W)),                                         # R1 map
                inv_spec((H, W)),                                         # M0_trans
                inv_spec((H, W)),                                         # sig_baseline - M_steady
                inv_spec((2 * Hs, H)),                                    # [A_r ; A_i] (row-padded)
                inv_spec((W, 2 * W)),                                     # [AcT_r | AcT_i]
            ],
            out_specs=(pl.BlockSpec((t_blk, H, W), lambda i: (i, 0, 0)),
                       pl.BlockSpec((t_blk, H, W), lambda i: (i, 0, 0))),
            compiler_params=pltpu.CompilerParams(
                dimension_semantics=("parallel",),
                vmem_limit_bytes=self._vmem_limit_bytes(single_buffer_invariants)),
        )

    # --------------------------------------------------------------------- forward
    def forward(self, x):
        T, H, W = self.T, self.H, self.W
        x = jnp.asarray(x, jnp.float32)
        assert list(x.shape) == self.ishape, f"input shape mismatch: {x.shape}"
        x2 = x.reshape(2, H, W)

        args = (self._k_dev, self._c_dev, x2, self._r1_dev, self._m0t_dev,
                self._off_dev, self.a_row_stk, self.a_colT_stk)

        if self._call is None:
            # Prefer single-buffered invariant inputs; fall back to default
            # double-buffering if this JAX build rejects pl.Buffered(1).
            try:
                fn = self._build_pallas_call(single_buffer_invariants=True)
                out_r, out_i = fn(*args)
            except Exception:
                fn = self._build_pallas_call(single_buffer_invariants=False)
                out_r, out_i = fn(*args)
            self._call = fn
        else:
            out_r, out_i = self._call(*args)

        if out_r.shape[0] != T:          # drop padded tail frames (only if t_blk !| T)
            out_r = out_r[:T]
            out_i = out_i[:T]
        # TODO(synk): Mosaic has no complex dtype, so the complex64 packing stays in
        # the wrapper (the kernel already emits lane-dense separate real/imag planes).
        y = jax.lax.complex(out_r, out_i)
        return y.reshape([T] + self.ishape[1:]).astype(jnp.complex64)


def _reference_forward(model, x):
    """Pure numpy reference mirroring the PyTorch forward."""
    x = np.asarray(x, np.float32)
    mult = np.stack([model.k_time, model.Cp], axis=1)                # (T, 2)
    ca = (mult @ x.reshape(2, -1)).reshape([model.T] + model.ishape[1:]).astype(np.float32)

    cos_fa = np.cos(model.FA_radian)
    e1ca = np.exp(-model.TR * (model.r1 + model.R1CA * ca))
    ca_trans = model.m0_trans * (1.0 - e1ca) / (1.0 - e1ca * cos_fa)
    sig = ca_trans + model.sig_baseline - model.m_steady

    s = np.fft.fftshift(sig, axes=(-2, -1))
    s = np.fft.fft2(s, axes=(-2, -1), norm="ortho")
    s = np.fft.fftshift(s, axes=(-2, -1))
    return s.astype(np.complex64)


if __name__ == "__main__":
    # small shapes consistent with the module: N_time=8, spatial 16x16
    T, H, W = 8, 16, 16
    ishape = [2, 1, 1, H, W]
    sample_time = np.arange(1, T + 1, 1) * 5.0 / 60.0

    key = jax.random.PRNGKey(0)
    k1, k2, k3, k4 = jax.random.split(key, 4)
    sig_baseline = jax.random.uniform(k1, (1, 1, H, W), jnp.float32, 0.5, 1.5)
    R1 = jax.random.uniform(k2, (1, 1, H, W), jnp.float32, 0.5, 1.5)
    Cp = jax.random.uniform(k3, (1, T), jnp.float32, 0.0, 1.0)   # (1, T) like torch input
    x = jax.random.uniform(k4, tuple(ishape), jnp.float32, 0.0, 0.05)

    model = DCE(ishape, sample_time, np.asarray(sig_baseline),
                np.asarray(R1), np.asarray(Cp))
    y = jax.block_until_ready(model.forward(x))

    y_ref = _reference_forward(model, np.asarray(x))
    err = float(np.max(np.abs(np.asarray(y) - y_ref)))
    scale = float(np.max(np.abs(y_ref)))
    # bf16 MXU operands (f32 accumulation): allow ~2 bf16 ulps of the largest output.
    if np.dtype(model.matmul_dtype).itemsize < 4:
        tol = 8e-3 * scale + 1e-3
    else:
        tol = 2e-3 * scale + 1e-3
    assert y.shape == (T, 1, 1, H, W) and y.dtype == jnp.complex64
    assert err < tol, f"max abs error {err} exceeds tol {tol}"
    print("KERNEL_OK")
</pallas_src>

<mosaic_0001>
module attributes {stable_mosaic.version = 11 : i64} {
  func.func @_dce_kernel(%arg0: i32, %arg1: memref<1x4x1x1xf32, #tpu.memory_space<vmem>>, %arg2: memref<1x4x1x1xf32, #tpu.memory_space<vmem>>, %arg3: memref<2x16x16xf32, #tpu.memory_space<vmem>>, %arg4: memref<16x16xf32, #tpu.memory_space<vmem>>, %arg5: memref<16x16xf32, #tpu.memory_space<vmem>>, %arg6: memref<16x16xf32, #tpu.memory_space<vmem>>, %arg7: memref<32x16xbf16, #tpu.memory_space<vmem>>, %arg8: memref<16x32xbf16, #tpu.memory_space<vmem>>, %arg9: memref<4x16x16xf32, #tpu.memory_space<vmem>>, %arg10: memref<4x16x16xf32, #tpu.memory_space<vmem>>) attributes {dimension_semantics = [#tpu.dimension_semantics<parallel>], iteration_bounds = array<i64: 2>, scalar_prefetch = 0 : i64, scratch_operands = 0 : i64, tpu.core_type = #tpu.core_type<tc>, window_params = [{transform_indices = @transform_0, window_bounds = array<i64: 1, 4, 1, 1>}, {transform_indices = @transform_1, window_bounds = array<i64: 1, 4, 1, 1>}, {pipeline_mode = #tpu.pipeline_mode<synchronous>, transform_indices = @transform_2, window_bounds = array<i64: 2, 16, 16>}, {pipeline_mode = #tpu.pipeline_mode<synchronous>, transform_indices = @transform_3, window_bounds = array<i64: 16, 16>}, {pipeline_mode = #tpu.pipeline_mode<synchronous>, transform_indices = @transform_4, window_bounds = array<i64: 16, 16>}, {pipeline_mode = #tpu.pipeline_mode<synchronous>, transform_indices = @transform_5, window_bounds = array<i64: 16, 16>}, {pipeline_mode = #tpu.pipeline_mode<synchronous>, transform_indices = @transform_6, window_bounds = array<i64: 32, 16>}, {pipeline_mode = #tpu.pipeline_mode<synchronous>, transform_indices = @transform_7, window_bounds = array<i64: 16, 32>}, {transform_indices = @transform_8, window_bounds = array<i64: 4, 16, 16>}, {transform_indices = @transform_9, window_bounds = array<i64: 4, 16, 16>}]} {
    %c0 = arith.constant 0 : index
    %c0_0 = arith.constant 0 : index
    %c0_1 = arith.constant 0 : index
    %c0_2 = arith.constant 0 : index
    %0 = vector.load %arg1[%c0, %c0_0, %c0_1, %c0_2] : memref<1x4x1x1xf32, #tpu.memory_space<vmem>>, vector<1x4x1x1xf32>
    %1 = vector.shape_cast %0 : vector<1x4x1x1xf32> to vector<4x1x1xf32>
    %c0_3 = arith.constant 0 : index
    %c0_4 = arith.constant 0 : index
    %c0_5 = arith.constant 0 : index
    %c0_6 = arith.constant 0 : index
    %2 = vector.load %arg2[%c0_3, %c0_4, %c0_5, %c0_6] : memref<1x4x1x1xf32, #tpu.memory_space<vmem>>, vector<1x4x1x1xf32>
    %3 = vector.shape_cast %2 : vector<1x4x1x1xf32> to vector<4x1x1xf32>
    %c0_7 = arith.constant 0 : index
    %c0_8 = arith.constant 0 : index
    %c0_9 = arith.constant 0 : index
    %4 = vector.load %arg3[%c0_7, %c0_8, %c0_9] : memref<2x16x16xf32, #tpu.memory_space<vmem>>, vector<1x16x16xf32>
    %5 = vector.shape_cast %4 : vector<1x16x16xf32> to vector<16x16xf32>
    %6 = vector.shape_cast %5 : vector<16x16xf32> to vector<1x16x16xf32>
    %c1 = arith.constant 1 : index
    %c0_10 = arith.constant 0 : index
    %c0_11 = arith.constant 0 : index
    %7 = vector.load %arg3[%c1, %c0_10, %c0_11] : memref<2x16x16xf32, #tpu.memory_space<vmem>>, vector<1x16x16xf32>
    %8 = vector.shape_cast %7 : vector<1x16x16xf32> to vector<16x16xf32>
    %9 = vector.shape_cast %8 : vector<16x16xf32> to vector<1x16x16xf32>
    %c0_12 = arith.constant 0 : index
    %c0_13 = arith.constant 0 : index
    %10 = vector.load %arg4[%c0_12, %c0_13] : memref<16x16xf32, #tpu.memory_space<vmem>>, vector<16x16xf32>
    %11 = vector.shape_cast %10 : vector<16x16xf32> to vector<1x16x16xf32>
    %c0_14 = arith.constant 0 : index
    %c0_15 = arith.constant 0 : index
    %12 = vector.load %arg5[%c0_14, %c0_15] : memref<16x16xf32, #tpu.memory_space<vmem>>, vector<16x16xf32>
    %13 = vector.shape_cast %12 : vector<16x16xf32> to vector<1x16x16xf32>
    %c0_16 = arith.constant 0 : index
    %c0_17 = arith.constant 0 : index
    %14 = vector.load %arg6[%c0_16, %c0_17] : memref<16x16xf32, #tpu.memory_space<vmem>>, vector<16x16xf32>
    %15 = vector.shape_cast %14 : vector<16x16xf32> to vector<1x16x16xf32>
    %c0_18 = arith.constant 0 : index
    %c0_19 = arith.constant 0 : index
    %16 = vector.load %arg8[%c0_18, %c0_19] : memref<16x32xbf16, #tpu.memory_space<vmem>>, vector<16x32xbf16>
    %c0_20 = arith.constant 0 : index
    %c0_21 = arith.constant 0 : index
    %17 = vector.load %arg7[%c0_20, %c0_21] : memref<32x16xbf16, #tpu.memory_space<vmem>>, vector<32x16xbf16>
    %18 = vector.extract_strided_slice %1 {offsets = [0, 0, 0], sizes = [2, 1, 1], strides = [1, 1, 1]} : vector<4x1x1xf32> to vector<2x1x1xf32>
    %19 = vector.broadcast %18 : vector<2x1x1xf32> to vector<2x16x16xf32>
    %20 = vector.broadcast %6 : vector<1x16x16xf32> to vector<2x16x16xf32>
    %21 = arith.mulf %19, %20 : vector<2x16x16xf32>
    %22 = vector.extract_strided_slice %3 {offsets = [0, 0, 0], sizes = [2, 1, 1], strides = [1, 1, 1]} : vector<4x1x1xf32> to vector<2x1x1xf32>
    %23 = vector.broadcast %22 : vector<2x1x1xf32> to vector<2x16x16xf32>
    %24 = vector.broadcast %9 : vector<1x16x16xf32> to vector<2x16x16xf32>
    %25 = arith.mulf %23, %24 : vector<2x16x16xf32>
    %26 = arith.addf %21, %25 : vector<2x16x16xf32>
    %cst = arith.constant 4.390000e+00 : f32
    %27 = vector.broadcast %cst : f32 to vector<2x16x16xf32>
    %28 = arith.mulf %27, %26 : vector<2x16x16xf32>
    %29 = vector.broadcast %11 : vector<1x16x16xf32> to vector<2x16x16xf32>
    %30 = arith.addf %29, %28 : vector<2x16x16xf32>
    %cst_22 = arith.constant -6.000000e-03 : f32
    %31 = vector.broadcast %cst_22 : f32 to vector<2x16x16xf32>
    %32 = arith.mulf %31, %30 : vector<2x16x16xf32>
    %33 = math.exp %32 : vector<2x16x16xf32>
    %cst_23 = arith.constant 1.000000e+00 : f32
    %34 = vector.broadcast %cst_23 : f32 to vector<2x16x16xf32>
    %35 = arith.subf %34, %33 : vector<2x16x16xf32>
    %36 = vector.broadcast %13 : vector<1x16x16xf32> to vector<2x16x16xf32>
    %37 = arith.mulf %36, %35 : vector<2x16x16xf32>
    %cst_24 = arith.constant 0.965925812 : f32
    %38 = vector.broadcast %cst_24 : f32 to vector<2x16x16xf32>
    %39 = arith.mulf %38, %33 : vector<2x16x16xf32>
    %cst_25 = arith.constant 1.000000e+00 : f32
    %40 = vector.broadcast %cst_25 : f32 to vector<2x16x16xf32>
    %41 = arith.subf %40, %39 : vector<2x16x16xf32>
    %42 = tpu.reciprocal %41 {approx = true} : vector<2x16x16xf32> -> vector<2x16x16xf32>
    %43 = arith.mulf %37, %42 : vector<2x16x16xf32>
    %44 = vector.broadcast %15 : vector<1x16x16xf32> to vector<2x16x16xf32>
    %45 = arith.addf %43, %44 : vector<2x16x16xf32>
    %46 = vector.shape_cast %45 : vector<2x16x16xf32> to vector<32x16xf32>
    %47 = arith.truncf %46 : vector<32x16xf32> to vector<32x16xbf16>
    %cst_26 = arith.constant dense<0.000000e+00> : vector<32x32xf32>
    %48 = tpu.matmul %47, %16, %cst_26 {dimension_numbers = #tpu.dot_dimension_numbers<[1], [0], [0], [1], [0, 0, 1, 1], [], []>} : vector<32x16xbf16>, vector<16x32xbf16>, vector<32x32xf32> -> vector<32x32xf32>
    %49 = arith.truncf %48 : vector<32x32xf32> to vector<32x32xbf16>
    %50 = vector.extract_strided_slice %49 {offsets = [0, 0], sizes = [16, 32], strides = [1, 1]} : vector<32x32xbf16> to vector<16x32xbf16>
    %cst_27 = arith.constant dense<0.000000e+00> : vector<32x32xf32>
    %51 = tpu.matmul %17, %50, %cst_27 {dimension_numbers = #tpu.dot_dimension_numbers<[1], [0], [0], [1], [0, 0, 1, 1], [], []>} : vector<32x16xbf16>, vector<16x32xbf16>, vector<32x32xf32> -> vector<32x32xf32>
    %52 = vector.extract_strided_slice %51 {offsets = [0, 0], sizes = [16, 32], strides = [1, 1]} : vector<32x32xf32> to vector<16x32xf32>
    %53 = vector.extract_strided_slice %51 {offsets = [16, 0], sizes = [16, 32], strides = [1, 1]} : vector<32x32xf32> to vector<16x32xf32>
    %54 = vector.extract_strided_slice %52 {offsets = [0, 0], sizes = [16, 16], strides = [1, 1]} : vector<16x32xf32> to vector<16x16xf32>
    %55 = vector.extract_strided_slice %53 {offsets = [0, 16], sizes = [16, 16], strides = [1, 1]} : vector<16x32xf32> to vector<16x16xf32>
    %56 = arith.subf %54, %55 : vector<16x16xf32>
    %c0_28 = arith.constant 0 : index
    %c0_29 = arith.constant 0 : index
    %c0_30 = arith.constant 0 : index
    %57 = vector.load %arg9[%c0_28, %c0_29, %c0_30] : memref<4x16x16xf32, #tpu.memory_space<vmem>>, vector<1x16x16xf32>
    %58 = vector.shape_cast %57 : vector<1x16x16xf32> to vector<16x16xf32>
    %59 = vector.shape_cast %56 : vector<16x16xf32> to vector<1x16x16xf32>
    tpu.vector_store %arg9[%c0_28, %c0_29, %c0_30], %59 {strides = array<i32>} : memref<4x16x16xf32, #tpu.memory_space<vmem>>, vector<1x16x16xf32>,
    %60 = vector.extract_strided_slice %52 {offsets = [0, 16], sizes = [16, 16], strides = [1, 1]} : vector<16x32xf32> to vector<16x16xf32>
    %61 = vector.extract_strided_slice %53 {offsets = [0, 0], sizes = [16, 16], strides = [1, 1]} : vector<16x32xf32> to vector<16x16xf32>
    %62 = arith.addf %60, %61 : vector<16x16xf32>
    %c0_31 = arith.constant 0 : index
    %c0_32 = arith.constant 0 : index
    %c0_33 = arith.constant 0 : index
    %63 = vector.load %arg10[%c0_31, %c0_32, %c0_33] : memref<4x16x16xf32, #tpu.memory_space<vmem>>, vector<1x16x16xf32>
    %64 = vector.shape_cast %63 : vector<1x16x16xf32> to vector<16x16xf32>
    %65 = vector.shape_cast %62 : vector<16x16xf32> to vector<1x16x16xf32>
    tpu.vector_store %arg10[%c0_31, %c0_32, %c0_33], %65 {strides = array<i32>} : memref<4x16x16xf32, #tpu.memory_space<vmem>>, vector<1x16x16xf32>,
    %66 = vector.extract_strided_slice %49 {offsets = [16, 0], sizes = [16, 32], strides = [1, 1]} : vector<32x32xbf16> to vector<16x32xbf16>
    %cst_34 = arith.constant dense<0.000000e+00> : vector<32x32xf32>
    %67 = tpu.matmul %17, %66, %cst_34 {dimension_numbers = #tpu.dot_dimension_numbers<[1], [0], [0], [1], [0, 0, 1, 1], [], []>} : vector<32x16xbf16>, vector<16x32xbf16>, vector<32x32xf32> -> vector<32x32xf32>
    %68 = vector.extract_strided_slice %67 {offsets = [0, 0], sizes = [16, 32], strides = [1, 1]} : vector<32x32xf32> to vector<16x32xf32>
    %69 = vector.extract_strided_slice %67 {offsets = [16, 0], sizes = [16, 32], strides = [1, 1]} : vector<32x32xf32> to vector<16x32xf32>
    %70 = vector.extract_strided_slice %68 {offsets = [0, 0], sizes = [16, 16], strides = [1, 1]} : vector<16x32xf32> to vector<16x16xf32>
    %71 = vector.extract_strided_slice %69 {offsets = [0, 16], sizes = [16, 16], strides = [1, 1]} : vector<16x32xf32> to vector<16x16xf32>
    %72 = arith.subf %70, %71 : vector<16x16xf32>
    %c1_35 = arith.constant 1 : index
    %c0_36 = arith.constant 0 : index
    %c0_37 = arith.constant 0 : index
    %73 = vector.load %arg9[%c1_35, %c0_36, %c0_37] : memref<4x16x16xf32, #tpu.memory_space<vmem>>, vector<1x16x16xf32>
    %74 = vector.shape_cast %73 : vector<1x16x16xf32> to vector<16x16xf32>
    %75 = vector.shape_cast %72 : vector<16x16xf32> to vector<1x16x16xf32>
    tpu.vector_store %arg9[%c1_35, %c0_36, %c0_37], %75 {strides = array<i32>} : memref<4x16x16xf32, #tpu.memory_space<vmem>>, vector<1x16x16xf32>,
    %76 = vector.extract_strided_slice %68 {offsets = [0, 16], sizes = [16, 16], strides = [1, 1]} : vector<16x32xf32> to vector<16x16xf32>
    %77 = vector.extract_strided_slice %69 {offsets = [0, 0], sizes = [16, 16], strides = [1, 1]} : vector<16x32xf32> to vector<16x16xf32>
    %78 = arith.addf %76, %77 : vector<16x16xf32>
    %c1_38 = arith.constant 1 : index
    %c0_39 = arith.constant 0 : index
    %c0_40 = arith.constant 0 : index
    %79 = vector.load %arg10[%c1_38, %c0_39, %c0_40] : memref<4x16x16xf32, #tpu.memory_space<vmem>>, vector<1x16x16xf32>
    %80 = vector.shape_cast %79 : vector<1x16x16xf32> to vector<16x16xf32>
    %81 = vector.shape_cast %78 : vector<16x16xf32> to vector<1x16x16xf32>
    tpu.vector_store %arg10[%c1_38, %c0_39, %c0_40], %81 {strides = array<i32>} : memref<4x16x16xf32, #tpu.memory_space<vmem>>, vector<1x16x16xf32>,
    %82 = vector.extract_strided_slice %1 {offsets = [2, 0, 0], sizes = [2, 1, 1], strides = [1, 1, 1]} : vector<4x1x1xf32> to vector<2x1x1xf32>
    %83 = vector.broadcast %82 : vector<2x1x1xf32> to vector<2x16x16xf32>
    %84 = vector.broadcast %6 : vector<1x16x16xf32> to vector<2x16x16xf32>
    %85 = arith.mulf %83, %84 : vector<2x16x16xf32>
    %86 = vector.extract_strided_slice %3 {offsets = [2, 0, 0], sizes = [2, 1, 1], strides = [1, 1, 1]} : vector<4x1x1xf32> to vector<2x1x1xf32>
    %87 = vector.broadcast %86 : vector<2x1x1xf32> to vector<2x16x16xf32>
    %88 = vector.broadcast %9 : vector<1x16x16xf32> to vector<2x16x16xf32>
    %89 = arith.mulf %87, %88 : vector<2x16x16xf32>
    %90 = arith.addf %85, %89 : vector<2x16x16xf32>
    %cst_41 = arith.constant 4.390000e+00 : f32
    %91 = vector.broadcast %cst_41 : f32 to vector<2x16x16xf32>
    %92 = arith.mulf %91, %90 : vector<2x16x16xf32>
    %93 = vector.broadcast %11 : vector<1x16x16xf32> to vector<2x16x16xf32>
    %94 = arith.addf %93, %92 : vector<2x16x16xf32>
    %cst_42 = arith.constant -6.000000e-03 : f32
    %95 = vector.broadcast %cst_42 : f32 to vector<2x16x16xf32>
    %96 = arith.mulf %95, %94 : vector<2x16x16xf32>
    %97 = math.exp %96 : vector<2x16x16xf32>
    %cst_43 = arith.constant 1.000000e+00 : f32
    %98 = vector.broadcast %cst_43 : f32 to vector<2x16x16xf32>
    %99 = arith.subf %98, %97 : vector<2x16x16xf32>
    %100 = vector.broadcast %13 : vector<1x16x16xf32> to vector<2x16x16xf32>
    %101 = arith.mulf %100, %99 : vector<2x16x16xf32>
    %cst_44 = arith.constant 0.965925812 : f32
    %102 = vector.broadcast %cst_44 : f32 to vector<2x16x16xf32>
    %103 = arith.mulf %102, %97 : vector<2x16x16xf32>
    %cst_45 = arith.constant 1.000000e+00 : f32
    %104 = vector.broadcast %cst_45 : f32 to vector<2x16x16xf32>
    %105 = arith.subf %104, %103 : vector<2x16x16xf32>
    %106 = tpu.reciprocal %105 {approx = true} : vector<2x16x16xf32> -> vector<2x16x16xf32>
    %107 = arith.mulf %101, %106 : vector<2x16x16xf32>
    %108 = vector.broadcast %15 : vector<1x16x16xf32> to vector<2x16x16xf32>
    %109 = arith.addf %107, %108 : vector<2x16x16xf32>
    %110 = vector.shape_cast %109 : vector<2x16x16xf32> to vector<32x16xf32>
    %111 = arith.truncf %110 : vector<32x16xf32> to vector<32x16xbf16>
    %cst_46 = arith.constant dense<0.000000e+00> : vector<32x32xf32>
    %112 = tpu.matmul %111, %16, %cst_46 {dimension_numbers = #tpu.dot_dimension_numbers<[1], [0], [0], [1], [0, 0, 1, 1], [], []>} : vector<32x16xbf16>, vector<16x32xbf16>, vector<32x32xf32> -> vector<32x32xf32>
    %113 = arith.truncf %112 : vector<32x32xf32> to vector<32x32xbf16>
    %114 = vector.extract_strided_slice %113 {offsets = [0, 0], sizes = [16, 32], strides = [1, 1]} : vector<32x32xbf16> to vector<16x32xbf16>
    %cst_47 = arith.constant dense<0.000000e+00> : vector<32x32xf32>
    %115 = tpu.matmul %17, %114, %cst_47 {dimension_numbers = #tpu.dot_dimension_numbers<[1], [0], [0], [1], [0, 0, 1, 1], [], []>} : vector<32x16xbf16>, vector<16x32xbf16>, vector<32x32xf32> -> vector<32x32xf32>
    %116 = vector.extract_strided_slice %115 {offsets = [0, 0], sizes = [16, 32], strides = [1, 1]} : vector<32x32xf32> to vector<16x32xf32>
    %117 = vector.extract_strided_slice %115 {offsets = [16, 0], sizes = [16, 32], strides = [1, 1]} : vector<32x32xf32> to vector<16x32xf32>
    %118 = vector.extract_strided_slice %116 {offsets = [0, 0], sizes = [16, 16], strides = [1, 1]} : vector<16x32xf32> to vector<16x16xf32>
    %119 = vector.extract_strided_slice %117 {offsets = [0, 16], sizes = [16, 16], strides = [1, 1]} : vector<16x32xf32> to vector<16x16xf32>
    %120 = arith.subf %118, %119 : vector<16x16xf32>
    %c2 = arith.constant 2 : index
    %c0_48 = arith.constant 0 : index
    %c0_49 = arith.constant 0 : index
    %121 = vector.load %arg9[%c2, %c0_48, %c0_49] : memref<4x16x16xf32, #tpu.memory_space<vmem>>, vector<1x16x16xf32>
    %122 = vector.shape_cast %121 : vector<1x16x16xf32> to vector<16x16xf32>
    %123 = vector.shape_cast %120 : vector<16x16xf32> to vector<1x16x16xf32>
    tpu.vector_store %arg9[%c2, %c0_48, %c0_49], %123 {strides = array<i32>} : memref<4x16x16xf32, #tpu.memory_space<vmem>>, vector<1x16x16xf32>,
    %124 = vector.extract_strided_slice %116 {offsets = [0, 16], sizes = [16, 16], strides = [1, 1]} : vector<16x32xf32> to vector<16x16xf32>
    %125 = vector.extract_strided_slice %117 {offsets = [0, 0], sizes = [16, 16], strides = [1, 1]} : vector<16x32xf32> to vector<16x16xf32>
    %126 = arith.addf %124, %125 : vector<16x16xf32>
    %c2_50 = arith.constant 2 : index
    %c0_51 = arith.constant 0 : index
    %c0_52 = arith.constant 0 : index
    %127 = vector.load %arg10[%c2_50, %c0_51, %c0_52] : memref<4x16x16xf32, #tpu.memory_space<vmem>>, vector<1x16x16xf32>
    %128 = vector.shape_cast %127 : vector<1x16x16xf32> to vector<16x16xf32>
    %129 = vector.shape_cast %126 : vector<16x16xf32> to vector<1x16x16xf32>
    tpu.vector_store %arg10[%c2_50, %c0_51, %c0_52], %129 {strides = array<i32>} : memref<4x16x16xf32, #tpu.memory_space<vmem>>, vector<1x16x16xf32>,
    %130 = vector.extract_strided_slice %113 {offsets = [16, 0], sizes = [16, 32], strides = [1, 1]} : vector<32x32xbf16> to vector<16x32xbf16>
    %cst_53 = arith.constant dense<0.000000e+00> : vector<32x32xf32>
    %131 = tpu.matmul %17, %130, %cst_53 {dimension_numbers = #tpu.dot_dimension_numbers<[1], [0], [0], [1], [0, 0, 1, 1], [], []>} : vector<32x16xbf16>, vector<16x32xbf16>, vector<32x32xf32> -> vector<32x32xf32>
    %132 = vector.extract_strided_slice %131 {offsets = [0, 0], sizes = [16, 32], strides = [1, 1]} : vector<32x32xf32> to vector<16x32xf32>
    %133 = vector.extract_strided_slice %131 {offsets = [16, 0], sizes = [16, 32], strides = [1, 1]} : vector<32x32xf32> to vector<16x32xf32>
    %134 = vector.extract_strided_slice %132 {offsets = [0, 0], sizes = [16, 16], strides = [1, 1]} : vector<16x32xf32> to vector<16x16xf32>
    %135 = vector.extract_strided_slice %133 {offsets = [0, 16], sizes = [16, 16], strides = [1, 1]} : vector<16x32xf32> to vector<16x16xf32>
    %136 = arith.subf %134, %135 : vector<16x16xf32>
    %c3 = arith.constant 3 : index
    %c0_54 = arith.constant 0 : index
    %c0_55 = arith.constant 0 : index
    %137 = vector.load %arg9[%c3, %c0_54, %c0_55] : memref<4x16x16xf32, #tpu.memory_space<vmem>>, vector<1x16x16xf32>
    %138 = vector.shape_cast %137 : vector<1x16x16xf32> to vector<16x16xf32>
    %139 = vector.shape_cast %136 : vector<16x16xf32> to vector<1x16x16xf32>
    tpu.vector_store %arg9[%c3, %c0_54, %c0_55], %139 {strides = array<i32>} : memref<4x16x16xf32, #tpu.memory_space<vmem>>, vector<1x16x16xf32>,
    %140 = vector.extract_strided_slice %132 {offsets = [0, 16], sizes = [16, 16], strides = [1, 1]} : vector<16x32xf32> to vector<16x16xf32>
    %141 = vector.extract_strided_slice %133 {offsets = [0, 0], sizes = [16, 16], strides = [1, 1]} : vector<16x32xf32> to vector<16x16xf32>
    %142 = arith.addf %140, %141 : vector<16x16xf32>
    %c3_56 = arith.constant 3 : index
    %c0_57 = arith.constant 0 : index
    %c0_58 = arith.constant 0 : index
    %143 = vector.load %arg10[%c3_56, %c0_57, %c0_58] : memref<4x16x16xf32, #tpu.memory_space<vmem>>, vector<1x16x16xf32>
    %144 = vector.shape_cast %143 : vector<1x16x16xf32> to vector<16x16xf32>
    %145 = vector.shape_cast %142 : vector<16x16xf32> to vector<1x16x16xf32>
    tpu.vector_store %arg10[%c3_56, %c0_57, %c0_58], %145 {strides = array<i32>} : memref<4x16x16xf32, #tpu.memory_space<vmem>>, vector<1x16x16xf32>,
    return
  }
  func.func @transform_0(%arg0: i32) -> (i32, i32, i32, i32) {
    %c0_i32 = arith.constant 0 : i32
    %c0_i32_0 = arith.constant 0 : i32
    %c0_i32_1 = arith.constant 0 : i32
    %c0_i32_2 = arith.constant 0 : i32
    return %arg0, %c0_i32, %c0_i32_0, %c0_i32_1 : i32, i32, i32, i32
  }
  func.func @transform_1(%arg0: i32) -> (i32, i32, i32, i32) {
    %c0_i32 = arith.constant 0 : i32
    %c0_i32_0 = arith.constant 0 : i32
    %c0_i32_1 = arith.constant 0 : i32
    %c0_i32_2 = arith.constant 0 : i32
    return %arg0, %c0_i32, %c0_i32_0, %c0_i32_1 : i32, i32, i32, i32
  }
  func.func @transform_2(%arg0: i32) -> (i32, i32, i32) {
    %c0_i32 = arith.constant 0 : i32
    %c0_i32_0 = arith.constant 0 : i32
    %c0_i32_1 = arith.constant 0 : i32
    %c0_i32_2 = arith.constant 0 : i32
    return %c0_i32, %c0_i32_0, %c0_i32_1 : i32, i32, i32
  }
  func.func @transform_3(%arg0: i32) -> (i32, i32) {
    %c0_i32 = arith.constant 0 : i32
    %c0_i32_0 = arith.constant 0 : i32
    %c0_i32_1 = arith.constant 0 : i32
    return %c0_i32, %c0_i32_0 : i32, i32
  }
  func.func @transform_4(%arg0: i32) -> (i32, i32) {
    %c0_i32 = arith.constant 0 : i32
    %c0_i32_0 = arith.constant 0 : i32
    %c0_i32_1 = arith.constant 0 : i32
    return %c0_i32, %c0_i32_0 : i32, i32
  }
  func.func @transform_5(%arg0: i32) -> (i32, i32) {
    %c0_i32 = arith.constant 0 : i32
    %c0_i32_0 = arith.constant 0 : i32
    %c0_i32_1 = arith.constant 0 : i32
    return %c0_i32, %c0_i32_0 : i32, i32
  }
  func.func @transform_6(%arg0: i32) -> (i32, i32) {
    %c0_i32 = arith.constant 0 : i32
    %c0_i32_0 = arith.constant 0 : i32
    %c0_i32_1 = arith.constant 0 : i32
    return %c0_i32, %c0_i32_0 : i32, i32
  }
  func.func @transform_7(%arg0: i32) -> (i32, i32) {
    %c0_i32 = arith.constant 0 : i32
    %c0_i32_0 = arith.constant 0 : i32
    %c0_i32_1 = arith.constant 0 : i32
    return %c0_i32, %c0_i32_0 : i32, i32
  }
  func.func @transform_8(%arg0: i32) -> (i32, i32, i32) {
    %c0_i32 = arith.constant 0 : i32
    %c0_i32_0 = arith.constant 0 : i32
    %c0_i32_1 = arith.constant 0 : i32
    return %arg0, %c0_i32, %c0_i32_0 : i32, i32, i32
  }
  func.func @transform_9(%arg0: i32) -> (i32, i32, i32) {
    %c0_i32 = arith.constant 0 : i32
    %c0_i32_0 = arith.constant 0 : i32
    %c0_i32_1 = arith.constant 0 : i32
    return %arg0, %c0_i32, %c0_i32_0 : i32, i32, i32
  }
}

module attributes {stable_mosaic.version = 11 : i64} {
  func.func @_dce_kernel(%arg0: i32, %arg1: memref<1x4x1x1xf32, #tpu.memory_space<vmem>>, %arg2: memref<1x4x1x1xf32, #tpu.memory_space<vmem>>, %arg3: memref<2x16x16xf32, #tpu.memory_space<vmem>>, %arg4: memref<16x16xf32, #tpu.memory_space<vmem>>, %arg5: memref<16x16xf32, #tpu.memory_space<vmem>>, %arg6: memref<16x16xf32, #tpu.memory_space<vmem>>, %arg7: memref<32x16xbf16, #tpu.memory_space<vmem>>, %arg8: memref<16x32xbf16, #tpu.memory_space<vmem>>, %arg9: memref<4x16x16xf32, #tpu.memory_space<vmem>>, %arg10: memref<4x16x16xf32, #tpu.memory_space<vmem>>) attributes {dimension_semantics = [#tpu.dimension_semantics<parallel>], iteration_bounds = array<i64: 2>, scalar_prefetch = 0 : i64, scratch_operands = 0 : i64, tpu.core_type = #tpu.core_type<tc>, window_params = [{transform_indices = @transform_0, window_bounds = array<i64: 1, 4, 1, 1>}, {transform_indices = @transform_1, window_bounds = array<i64: 1, 4, 1, 1>}, {pipeline_mode = #tpu.pipeline_mode<synchronous>, transform_indices = @transform_2, window_bounds = array<i64: 2, 16, 16>}, {pipeline_mode = #tpu.pipeline_mode<synchronous>, transform_indices = @transform_3, window_bounds = array<i64: 16, 16>}, {pipeline_mode = #tpu.pipeline_mode<synchronous>, transform_indices = @transform_4, window_bounds = array<i64: 16, 16>}, {pipeline_mode = #tpu.pipeline_mode<synchronous>, transform_indices = @transform_5, window_bounds = array<i64: 16, 16>}, {pipeline_mode = #tpu.pipeline_mode<synchronous>, transform_indices = @transform_6, window_bounds = array<i64: 32, 16>}, {pipeline_mode = #tpu.pipeline_mode<synchronous>, transform_indices = @transform_7, window_bounds = array<i64: 16, 32>}, {transform_indices = @transform_8, window_bounds = array<i64: 4, 16, 16>}, {transform_indices = @transform_9, window_bounds = array<i64: 4, 16, 16>}]} {
    %c0 = arith.constant 0 : index
    %c0_0 = arith.constant 0 : index
    %c0_1 = arith.constant 0 : index
    %c0_2 = arith.constant 0 : index
    %0 = vector.load %arg1[%c0, %c0_0, %c0_1, %c0_2] : memref<1x4x1x1xf32, #tpu.memory_space<vmem>>, vector<1x4x1x1xf32>
    %1 = vector.shape_cast %0 : vector<1x4x1x1xf32> to vector<4x1x1xf32>
    %c0_3 = arith.constant 0 : index
    %c0_4 = arith.constant 0 : index
    %c0_5 = arith.constant 0 : index
    %c0_6 = arith.constant 0 : index
    %2 = vector.load %arg2[%c0_3, %c0_4, %c0_5, %c0_6] : memref<1x4x1x1xf32, #tpu.memory_space<vmem>>, vector<1x4x1x1xf32>
    %3 = vector.shape_cast %2 : vector<1x4x1x1xf32> to vector<4x1x1xf32>
    %c0_7 = arith.constant 0 : index
    %c0_8 = arith.constant 0 : index
    %c0_9 = arith.constant 0 : index
    %4 = vector.load %arg3[%c0_7, %c0_8, %c0_9] : memref<2x16x16xf32, #tpu.memory_space<vmem>>, vector<1x16x16xf32>
    %5 = vector.shape_cast %4 : vector<1x16x16xf32> to vector<16x16xf32>
    %6 = vector.shape_cast %5 : vector<16x16xf32> to vector<1x16x16xf32>
    %c1 = arith.constant 1 : index
    %c0_10 = arith.constant 0 : index
    %c0_11 = arith.constant 0 : index
    %7 = vector.load %arg3[%c1, %c0_10, %c0_11] : memref<2x16x16xf32, #tpu.memory_space<vmem>>, vector<1x16x16xf32>
    %8 = vector.shape_cast %7 : vector<1x16x16xf32> to vector<16x16xf32>
    %9 = vector.shape_cast %8 : vector<16x16xf32> to vector<1x16x16xf32>
    %c0_12 = arith.constant 0 : index
    %c0_13 = arith.constant 0 : index
    %10 = vector.load %arg4[%c0_12, %c0_13] : memref<16x16xf32, #tpu.memory_space<vmem>>, vector<16x16xf32>
    %11 = vector.shape_cast %10 : vector<16x16xf32> to vector<1x16x16xf32>
    %c0_14 = arith.constant 0 : index
    %c0_15 = arith.constant 0 : index
    %12 = vector.load %arg5[%c0_14, %c0_15] : memref<16x16xf32, #tpu.memory_space<vmem>>, vector<16x16xf32>
    %13 = vector.shape_cast %12 : vector<16x16xf32> to vector<1x16x16xf32>
    %c0_16 = arith.constant 0 : index
    %c0_17 = arith.constant 0 : index
    %14 = vector.load %arg6[%c0_16, %c0_17] : memref<16x16xf32, #tpu.memory_space<vmem>>, vector<16x16xf32>
    %15 = vector.shape_cast %14 : vector<16x16xf32> to vector<1x16x16xf32>
    %c0_18 = arith.constant 0 : index
    %c0_19 = arith.constant 0 : index
    %16 = vector.load %arg8[%c0_18, %c0_19] : memref<16x32xbf16, #tpu.memory_space<vmem>>, vector<16x32xbf16>
    %c0_20 = arith.constant 0 : index
    %c0_21 = arith.constant 0 : index
    %17 = vector.load %arg7[%c0_20, %c0_21] : memref<32x16xbf16, #tpu.memory_space<vmem>>, vector<32x16xbf16>
    %18 = vector.extract_strided_slice %1 {offsets = [0, 0, 0], sizes = [2, 1, 1], strides = [1, 1, 1]} : vector<4x1x1xf32> to vector<2x1x1xf32>
    %19 = vector.broadcast %18 : vector<2x1x1xf32> to vector<2x16x16xf32>
    %20 = vector.broadcast %6 : vector<1x16x16xf32> to vector<2x16x16xf32>
    %21 = arith.mulf %19, %20 : vector<2x16x16xf32>
    %22 = vector.extract_strided_slice %3 {offsets = [0, 0, 0], sizes = [2, 1, 1], strides = [1, 1, 1]} : vector<4x1x1xf32> to vector<2x1x1xf32>
    %23 = vector.broadcast %22 : vector<2x1x1xf32> to vector<2x16x16xf32>
    %24 = vector.broadcast %9 : vector<1x16x16xf32> to vector<2x16x16xf32>
    %25 = arith.mulf %23, %24 : vector<2x16x16xf32>
    %26 = arith.addf %21, %25 : vector<2x16x16xf32>
    %cst = arith.constant 4.390000e+00 : f32
    %27 = vector.broadcast %cst : f32 to vector<2x16x16xf32>
    %28 = arith.mulf %27, %26 : vector<2x16x16xf32>
    %29 = vector.broadcast %11 : vector<1x16x16xf32> to vector<2x16x16xf32>
    %30 = arith.addf %29, %28 : vector<2x16x16xf32>
    %cst_22 = arith.constant -6.000000e-03 : f32
    %31 = vector.broadcast %cst_22 : f32 to vector<2x16x16xf32>
    %32 = arith.mulf %31, %30 : vector<2x16x16xf32>
    %33 = math.exp %32 : vector<2x16x16xf32>
    %cst_23 = arith.constant 1.000000e+00 : f32
    %34 = vector.broadcast %cst_23 : f32 to vector<2x16x16xf32>
    %35 = arith.subf %34, %33 : vector<2x16x16xf32>
    %36 = vector.broadcast %13 : vector<1x16x16xf32> to vector<2x16x16xf32>
    %37 = arith.mulf %36, %35 : vector<2x16x16xf32>
    %cst_24 = arith.constant 0.965925812 : f32
    %38 = vector.broadcast %cst_24 : f32 to vector<2x16x16xf32>
    %39 = arith.mulf %38, %33 : vector<2x16x16xf32>
    %cst_25 = arith.constant 1.000000e+00 : f32
    %40 = vector.broadcast %cst_25 : f32 to vector<2x16x16xf32>
    %41 = arith.subf %40, %39 : vector<2x16x16xf32>
    %42 = tpu.reciprocal %41 {approx = true} : vector<2x16x16xf32> -> vector<2x16x16xf32>
    %43 = arith.mulf %37, %42 : vector<2x16x16xf32>
    %44 = vector.broadcast %15 : vector<1x16x16xf32> to vector<2x16x16xf32>
    %45 = arith.addf %43, %44 : vector<2x16x16xf32>
    %46 = vector.shape_cast %45 : vector<2x16x16xf32> to vector<32x16xf32>
    %47 = arith.truncf %46 : vector<32x16xf32> to vector<32x16xbf16>
    %cst_26 = arith.constant dense<0.000000e+00> : vector<32x32xf32>
    %48 = tpu.matmul %47, %16, %cst_26 {dimension_numbers = #tpu.dot_dimension_numbers<[1], [0], [0], [1], [0, 0, 1, 1], [], []>} : vector<32x16xbf16>, vector<16x32xbf16>, vector<32x32xf32> -> vector<32x32xf32>
    %49 = arith.truncf %48 : vector<32x32xf32> to vector<32x32xbf16>
    %50 = vector.extract_strided_slice %49 {offsets = [0, 0], sizes = [16, 32], strides = [1, 1]} : vector<32x32xbf16> to vector<16x32xbf16>
    %cst_27 = arith.constant dense<0.000000e+00> : vector<32x32xf32>
    %51 = tpu.matmul %17, %50, %cst_27 {dimension_numbers = #tpu.dot_dimension_numbers<[1], [0], [0], [1], [0, 0, 1, 1], [], []>} : vector<32x16xbf16>, vector<16x32xbf16>, vector<32x32xf32> -> vector<32x32xf32>
    %52 = vector.extract_strided_slice %51 {offsets = [0, 0], sizes = [16, 32], strides = [1, 1]} : vector<32x32xf32> to vector<16x32xf32>
    %53 = vector.extract_strided_slice %51 {offsets = [16, 0], sizes = [16, 32], strides = [1, 1]} : vector<32x32xf32> to vector<16x32xf32>
    %54 = vector.extract_strided_slice %52 {offsets = [0, 0], sizes = [16, 16], strides = [1, 1]} : vector<16x32xf32> to vector<16x16xf32>
    %55 = vector.extract_strided_slice %53 {offsets = [0, 16], sizes = [16, 16], strides = [1, 1]} : vector<16x32xf32> to vector<16x16xf32>
    %56 = arith.subf %54, %55 : vector<16x16xf32>
    %c0_28 = arith.constant 0 : index
    %c0_29 = arith.constant 0 : index
    %c0_30 = arith.constant 0 : index
    %57 = vector.load %arg9[%c0_28, %c0_29, %c0_30] : memref<4x16x16xf32, #tpu.memory_space<vmem>>, vector<1x16x16xf32>
    %58 = vector.shape_cast %57 : vector<1x16x16xf32> to vector<16x16xf32>
    %59 = vector.shape_cast %56 : vector<16x16xf32> to vector<1x16x16xf32>
    tpu.vector_store %arg9[%c0_28, %c0_29, %c0_30], %59 {strides = array<i32>} : memref<4x16x16xf32, #tpu.memory_space<vmem>>, vector<1x16x16xf32>,
    %60 = vector.extract_strided_slice %52 {offsets = [0, 16], sizes = [16, 16], strides = [1, 1]} : vector<16x32xf32> to vector<16x16xf32>
    %61 = vector.extract_strided_slice %53 {offsets = [0, 0], sizes = [16, 16], strides = [1, 1]} : vector<16x32xf32> to vector<16x16xf32>
    %62 = arith.addf %60, %61 : vector<16x16xf32>
    %c0_31 = arith.constant 0 : index
    %c0_32 = arith.constant 0 : index
    %c0_33 = arith.constant 0 : index
    %63 = vector.load %arg10[%c0_31, %c0_32, %c0_33] : memref<4x16x16xf32, #tpu.memory_space<vmem>>, vector<1x16x16xf32>
    %64 = vector.shape_cast %63 : vector<1x16x16xf32> to vector<16x16xf32>
    %65 = vector.shape_cast %62 : vector<16x16xf32> to vector<1x16x16xf32>
    tpu.vector_store %arg10[%c0_31, %c0_32, %c0_33], %65 {strides = array<i32>} : memref<4x16x16xf32, #tpu.memory_space<vmem>>, vector<1x16x16xf32>,
    %66 = vector.extract_strided_slice %49 {offsets = [16, 0], sizes = [16, 32], strides = [1, 1]} : vector<32x32xbf16> to vector<16x32xbf16>
    %cst_34 = arith.constant dense<0.000000e+00> : vector<32x32xf32>
    %67 = tpu.matmul %17, %66, %cst_34 {dimension_numbers = #tpu.dot_dimension_numbers<[1], [0], [0], [1], [0, 0, 1, 1], [], []>} : vector<32x16xbf16>, vector<16x32xbf16>, vector<32x32xf32> -> vector<32x32xf32>
    %68 = vector.extract_strided_slice %67 {offsets = [0, 0], sizes = [16, 32], strides = [1, 1]} : vector<32x32xf32> to vector<16x32xf32>
    %69 = vector.extract_strided_slice %67 {offsets = [16, 0], sizes = [16, 32], strides = [1, 1]} : vector<32x32xf32> to vector<16x32xf32>
    %70 = vector.extract_strided_slice %68 {offsets = [0, 0], sizes = [16, 16], strides = [1, 1]} : vector<16x32xf32> to vector<16x16xf32>
    %71 = vector.extract_strided_slice %69 {offsets = [0, 16], sizes = [16, 16], strides = [1, 1]} : vector<16x32xf32> to vector<16x16xf32>
    %72 = arith.subf %70, %71 : vector<16x16xf32>
    %c1_35 = arith.constant 1 : index
    %c0_36 = arith.constant 0 : index
    %c0_37 = arith.constant 0 : index
    %73 = vector.load %arg9[%c1_35, %c0_36, %c0_37] : memref<4x16x16xf32, #tpu.memory_space<vmem>>, vector<1x16x16xf32>
    %74 = vector.shape_cast %73 : vector<1x16x16xf32> to vector<16x16xf32>
    %75 = vector.shape_cast %72 : vector<16x16xf32> to vector<1x16x16xf32>
    tpu.vector_store %arg9[%c1_35, %c0_36, %c0_37], %75 {strides = array<i32>} : memref<4x16x16xf32, #tpu.memory_space<vmem>>, vector<1x16x16xf32>,
    %76 = vector.extract_strided_slice %68 {offsets = [0, 16], sizes = [16, 16], strides = [1, 1]} : vector<16x32xf32> to vector<16x16xf32>
    %77 = vector.extract_strided_slice %69 {offsets = [0, 0], sizes = [16, 16], strides = [1, 1]} : vector<16x32xf32> to vector<16x16xf32>
    %78 = arith.addf %76, %77 : vector<16x16xf32>
    %c1_38 = arith.constant 1 : index
    %c0_39 = arith.constant 0 : index
    %c0_40 = arith.constant 0 : index
    %79 = vector.load %arg10[%c1_38, %c0_39, %c0_40] : memref<4x16x16xf32, #tpu.memory_space<vmem>>, vector<1x16x16xf32>
    %80 = vector.shape_cast %79 : vector<1x16x16xf32> to vector<16x16xf32>
    %81 = vector.shape_cast %78 : vector<16x16xf32> to vector<1x16x16xf32>
    tpu.vector_store %arg10[%c1_38, %c0_39, %c0_40], %81 {strides = array<i32>} : memref<4x16x16xf32, #tpu.memory_space<vmem>>, vector<1x16x16xf32>,
    %82 = vector.extract_strided_slice %1 {offsets = [2, 0, 0], sizes = [2, 1, 1], strides = [1, 1, 1]} : vector<4x1x1xf32> to vector<2x1x1xf32>
    %83 = vector.broadcast %82 : vector<2x1x1xf32> to vector<2x16x16xf32>
    %84 = vector.broadcast %6 : vector<1x16x16xf32> to vector<2x16x16xf32>
    %85 = arith.mulf %83, %84 : vector<2x16x16xf32>
    %86 = vector.extract_strided_slice %3 {offsets = [2, 0, 0], sizes = [2, 1, 1], strides = [1, 1, 1]} : vector<4x1x1xf32> to vector<2x1x1xf32>
    %87 = vector.broadcast %86 : vector<2x1x1xf32> to vector<2x16x16xf32>
    %88 = vector.broadcast %9 : vector<1x16x16xf32> to vector<2x16x16xf32>
    %89 = arith.mulf %87, %88 : vector<2x16x16xf32>
    %90 = arith.addf %85, %89 : vector<2x16x16xf32>
    %cst_41 = arith.constant 4.390000e+00 : f32
    %91 = vector.broadcast %cst_41 : f32 to vector<2x16x16xf32>
    %92 = arith.mulf %91, %90 : vector<2x16x16xf32>
    %93 = vector.broadcast %11 : vector<1x16x16xf32> to vector<2x16x16xf32>
    %94 = arith.addf %93, %92 : vector<2x16x16xf32>
    %cst_42 = arith.constant -6.000000e-03 : f32
    %95 = vector.broadcast %cst_42 : f32 to vector<2x16x16xf32>
    %96 = arith.mulf %95, %94 : vector<2x16x16xf32>
    %97 = math.exp %96 : vector<2x16x16xf32>
    %cst_43 = arith.constant 1.000000e+00 : f32
    %98 = vector.broadcast %cst_43 : f32 to vector<2x16x16xf32>
    %99 = arith.subf %98, %97 : vector<2x16x16xf32>
    %100 = vector.broadcast %13 : vector<1x16x16xf32> to vector<2x16x16xf32>
    %101 = arith.mulf %100, %99 : vector<2x16x16xf32>
    %cst_44 = arith.constant 0.965925812 : f32
    %102 = vector.broadcast %cst_44 : f32 to vector<2x16x16xf32>
    %103 = arith.mulf %102, %97 : vector<2x16x16xf32>
    %cst_45 = arith.constant 1.000000e+00 : f32
    %104 = vector.broadcast %cst_45 : f32 to vector<2x16x16xf32>
    %105 = arith.subf %104, %103 : vector<2x16x16xf32>
    %106 = tpu.reciprocal %105 {approx = true} : vector<2x16x16xf32> -> vector<2x16x16xf32>
    %107 = arith.mulf %101, %106 : vector<2x16x16xf32>
    %108 = vector.broadcast %15 : vector<1x16x16xf32> to vector<2x16x16xf32>
    %109 = arith.addf %107, %108 : vector<2x16x16xf32>
    %110 = vector.shape_cast %109 : vector<2x16x16xf32> to vector<32x16xf32>
    %111 = arith.truncf %110 : vector<32x16xf32> to vector<32x16xbf16>
    %cst_46 = arith.constant dense<0.000000e+00> : vector<32x32xf32>
    %112 = tpu.matmul %111, %16, %cst_46 {dimension_numbers = #tpu.dot_dimension_numbers<[1], [0], [0], [1], [0, 0, 1, 1], [], []>} : vector<32x16xbf16>, vector<16x32xbf16>, vector<32x32xf32> -> vector<32x32xf32>
    %113 = arith.truncf %112 : vector<32x32xf32> to vector<32x32xbf16>
    %114 = vector.extract_strided_slice %113 {offsets = [0, 0], sizes = [16, 32], strides = [1, 1]} : vector<32x32xbf16> to vector<16x32xbf16>
    %cst_47 = arith.constant dense<0.000000e+00> : vector<32x32xf32>
    %115 = tpu.matmul %17, %114, %cst_47 {dimension_numbers = #tpu.dot_dimension_numbers<[1], [0], [0], [1], [0, 0, 1, 1], [], []>} : vector<32x16xbf16>, vector<16x32xbf16>, vector<32x32xf32> -> vector<32x32xf32>
    %116 = vector.extract_strided_slice %115 {offsets = [0, 0], sizes = [16, 32], strides = [1, 1]} : vector<32x32xf32> to vector<16x32xf32>
    %117 = vector.extract_strided_slice %115 {offsets = [16, 0], sizes = [16, 32], strides = [1, 1]} : vector<32x32xf32> to vector<16x32xf32>
    %118 = vector.extract_strided_slice %116 {offsets = [0, 0], sizes = [16, 16], strides = [1, 1]} : vector<16x32xf32> to vector<16x16xf32>
    %119 = vector.extract_strided_slice %117 {offsets = [0, 16], sizes = [16, 16], strides = [1, 1]} : vector<16x32xf32> to vector<16x16xf32>
    %120 = arith.subf %118, %119 : vector<16x16xf32>
    %c2 = arith.constant 2 : index
    %c0_48 = arith.constant 0 : index
    %c0_49 = arith.constant 0 : index
    %121 = vector.load %arg9[%c2, %c0_48, %c0_49] : memref<4x16x16xf32, #tpu.memory_space<vmem>>, vector<1x16x16xf32>
    %122 = vector.shape_cast %121 : vector<1x16x16xf32> to vector<16x16xf32>
    %123 = vector.shape_cast %120 : vector<16x16xf32> to vector<1x16x16xf32>
    tpu.vector_store %arg9[%c2, %c0_48, %c0_49], %123 {strides = array<i32>} : memref<4x16x16xf32, #tpu.memory_space<vmem>>, vector<1x16x16xf32>,
    %124 = vector.extract_strided_slice %116 {offsets = [0, 16], sizes = [16, 16], strides = [1, 1]} : vector<16x32xf32> to vector<16x16xf32>
    %125 = vector.extract_strided_slice %117 {offsets = [0, 0], sizes = [16, 16], strides = [1, 1]} : vector<16x32xf32> to vector<16x16xf32>
    %126 = arith.addf %124, %125 : vector<16x16xf32>
    %c2_50 = arith.constant 2 : index
    %c0_51 = arith.constant 0 : index
    %c0_52 = arith.constant 0 : index
    %127 = vector.load %arg10[%c2_50, %c0_51, %c0_52] : memref<4x16x16xf32, #tpu.memory_space<vmem>>, vector<1x16x16xf32>
    %128 = vector.shape_cast %127 : vector<1x16x16xf32> to vector<16x16xf32>
    %129 = vector.shape_cast %126 : vector<16x16xf32> to vector<1x16x16xf32>
    tpu.vector_store %arg10[%c2_50, %c0_51, %c0_52], %129 {strides = array<i32>} : memref<4x16x16xf32, #tpu.memory_space<vmem>>, vector<1x16x16xf32>,
    %130 = vector.extract_strided_slice %113 {offsets = [16, 0], sizes = [16, 32], strides = [1, 1]} : vector<32x32xbf16> to vector<16x32xbf16>
    %cst_53 = arith.constant dense<0.000000e+00> : vector<32x32xf32>
    %131 = tpu.matmul %17, %130, %cst_53 {dimension_numbers = #tpu.dot_dimension_numbers<[1], [0], [0], [1], [0, 0, 1, 1], [], []>} : vector<32x16xbf16>, vector<16x32xbf16>, vector<32x32xf32> -> vector<32x32xf32>
    %132 = vector.extract_strided_slice %131 {offsets = [0, 0], sizes = [16, 32], strides = [1, 1]} : vector<32x32xf32> to vector<16x32xf32>
    %133 = vector.extract_strided_slice %131 {offsets = [16, 0], sizes = [16, 32], strides = [1, 1]} : vector<32x32xf32> to vector<16x32xf32>
    %134 = vector.extract_strided_slice %132 {offsets = [0, 0], sizes = [16, 16], strides = [1, 1]} : vector<16x32xf32> to vector<16x16xf32>
    %135 = vector.extract_strided_slice %133 {offsets = [0, 16], sizes = [16, 16], strides = [1, 1]} : vector<16x32xf32> to vector<16x16xf32>
    %136 = arith.subf %134, %135 : vector<16x16xf32>
    %c3 = arith.constant 3 : index
    %c0_54 = arith.constant 0 : index
    %c0_55 = arith.constant 0 : index
    %137 = vector.load %arg9[%c3, %c0_54, %c0_55] : memref<4x16x16xf32, #tpu.memory_space<vmem>>, vector<1x16x16xf32>
    %138 = vector.shape_cast %137 : vector<1x16x16xf32> to vector<16x16xf32>
    %139 = vector.shape_cast %136 : vector<16x16xf32> to vector<1x16x16xf32>
    tpu.vector_store %arg9[%c3, %c0_54, %c0_55], %139 {strides = array<i32>} : memref<4x16x16xf32, #tpu.memory_space<vmem>>, vector<1x16x16xf32>,
    %140 = vector.extract_strided_slice %132 {offsets = [0, 16], sizes = [16, 16], strides = [1, 1]} : vector<16x32xf32> to vector<16x16xf32>
    %141 = vector.extract_strided_slice %133 {offsets = [0, 0], sizes = [16, 16], strides = [1, 1]} : vector<16x32xf32> to vector<16x16xf32>
    %142 = arith.addf %140, %141 : vector<16x16xf32>
    %c3_56 = arith.constant 3 : index
    %c0_57 = arith.constant 0 : index
    %c0_58 = arith.constant 0 : index
    %143 = vector.load %arg10[%c3_56, %c0_57, %c0_58] : memref<4x16x16xf32, #tpu.memory_space<vmem>>, vector<1x16x16xf32>
    %144 = vector.shape_cast %143 : vector<1x16x16xf32> to vector<16x16xf32>
    %145 = vector.shape_cast %142 : vector<16x16xf32> to vector<1x16x16xf32>
    tpu.vector_store %arg10[%c3_56, %c0_57, %c0_58], %145 {strides = array<i32>} : memref<4x16x16xf32, #tpu.memory_space<vmem>>, vector<1x16x16xf32>,
    return
  }
  func.func @transform_0(%arg0: i32) -> (i32, i32, i32, i32) {
    %c0_i32 = arith.constant 0 : i32
    %c0_i32_0 = arith.constant 0 : i32
    %c0_i32_1 = arith.constant 0 : i32
    %c0_i32_2 = arith.constant 0 : i32
    return %arg0, %c0_i32, %c0_i32_0, %c0_i32_1 : i32, i32, i32, i32
  }
  func.func @transform_1(%arg0: i32) -> (i32, i32, i32, i32) {
    %c0_i32 = arith.constant 0 : i32
    %c0_i32_0 = arith.constant 0 : i32
    %c0_i32_1 = arith.constant 0 : i32
    %c0_i32_2 = arith.constant 0 : i32
    return %arg0, %c0_i32, %c0_i32_0, %c0_i32_1 : i32, i32, i32, i32
  }
  func.func @transform_2(%arg0: i32) -> (i32, i32, i32) {
    %c0_i32 = arith.constant 0 : i32
    %c0_i32_0 = arith.constant 0 : i32
    %c0_i32_1 = arith.constant 0 : i32
    %c0_i32_2 = arith.constant 0 : i32
    return %c0_i32, %c0_i32_0, %c0_i32_1 : i32, i32, i32
  }
  func.func @transform_3(%arg0: i32) -> (i32, i32) {
    %c0_i32 = arith.constant 0 : i32
    %c0_i32_0 = arith.constant 0 : i32
    %c0_i32_1 = arith.constant 0 : i32
    return %c0_i32, %c0_i32_0 : i32, i32
  }
  func.func @transform_4(%arg0: i32) -> (i32, i32) {
    %c0_i32 = arith.constant 0 : i32
    %c0_i32_0 = arith.constant 0 : i32
    %c0_i32_1 = arith.constant 0 : i32
    return %c0_i32, %c0_i32_0 : i32, i32
  }
  func.func @transform_5(%arg0: i32) -> (i32, i32) {
    %c0_i32 = arith.constant 0 : i32
    %c0_i32_0 = arith.constant 0 : i32
    %c0_i32_1 = arith.constant 0 : i32
    return %c0_i32, %c0_i32_0 : i32, i32
  }
  func.func @transform_6(%arg0: i32) -> (i32, i32) {
    %c0_i32 = arith.constant 0 : i32
    %c0_i32_0 = arith.constant 0 : i32
    %c0_i32_1 = arith.constant 0 : i32
    return %c0_i32, %c0_i32_0 : i32, i32
  }
  func.func @transform_7(%arg0: i32) -> (i32, i32) {
    %c0_i32 = arith.constant 0 : i32
    %c0_i32_0 = arith.constant 0 : i32
    %c0_i32_1 = arith.constant 0 : i32
    return %c0_i32, %c0_i32_0 : i32, i32
  }
  func.func @transform_8(%arg0: i32) -> (i32, i32, i32) {
    %c0_i32 = arith.constant 0 : i32
    %c0_i32_0 = arith.constant 0 : i32
    %c0_i32_1 = arith.constant 0 : i32
    return %arg0, %c0_i32, %c0_i32_0 : i32, i32, i32
  }
  func.func @transform_9(%arg0: i32) -> (i32, i32, i32) {
    %c0_i32 = arith.constant 0 : i32
    %c0_i32_0 = arith.constant 0 : i32
    %c0_i32_1 = arith.constant 0 : i32
    return %arg0, %c0_i32, %c0_i32_0 : i32, i32, i32
  }
}

</mosaic_0001>

<bundles_post_ra>
// kernel: tpu_custom_call.1
= control target key start
LH: loop header
LB: loop body
LE: loop exit
PB: predicated region body
PF: predicated region fallthrough
CT: control target
= control target key end

     0   :  { %s1928_s0 = inlined_call_operand.vmem [shape: f32[2,4,1,1], index: 0, kind: input, shape index: {}]   ;;  %s1929_s1 = inlined_call_operand.vmem [shape: f32[2,4,1,1], index: 1, kind: input, shape index: {}]   ;;  %s1930_s2 = inlined_call_operand.vmem [shape: f32[2,16,16], index: 2, kind: input, shape index: {}]   ;;  %s1931_s3 = inlined_call_operand.hbm [shape: f32[16,16], index: 3, kind: input, shape index: {}]   ;;  %s1932_s4 = inlined_call_operand.hbm [shape: f32[16,16], index: 4, kind: input, shape index: {}]   ;;  %s1933_s5 = inlined_call_operand.hbm [shape: f32[16,16], index: 5, kind: input, shape index: {}]   ;;  %s1934_s6 = inlined_call_operand.vmem [shape: bf16[32,16], index: 6, kind: input, shape index: {}]   ;;  %s1935_s7 = inlined_call_operand.hbm [shape: bf16[16,32], index: 7, kind: input, shape index: {}]   ;;  %s1936_s8 = inlined_call_operand.hbm [shape: f32[8,16,16], index: 8, kind: output, shape index: {0}]   ;;  %s1937_s9 = inlined_call_operand.hbm [shape: f32[8,16,16], index: 9, kind: output, shape index: {1}]  }
   0x1   :  { %1941 = sst [smem:[#allocation21_spill]] %s1931_s3 }
   0x2   :  { %1942 = sst [smem:[#allocation22_spill]] %s1932_s4 }
   0x3   :  { %15 = vsyncpa [#allocation3], 0 }
   0x4   :  { %16 = vsyncpa [#allocation6], 0 }
   0x5   :  { %17 = vsyncpa [#allocation9], 0 }
   0x6   :  { %18 = vsyncpa [#allocation4], 0 }
   0x7   :  { %20 = vsyncpa [#allocation4 + $0x1], 0 }
   0x8   :  { %21 = vsyncpa [#allocation12], 0 }
   0x9   :  { %23 = vsyncpa [#allocation12 + $0x1], 0  ;;  %s1619_s30 = smov 0   ;;  %s1621_s10 = smov 0  }
   0xa   :  { %s1623_s11 = smov 0   ;;  %s1625_s12 = smov 0  }
   0xb LB: > { %1943 = sst [smem:[#allocation18_spill]] %s1550_s11  ;;  %s1640_s13 = sadd.s32 4294967295, %s1554_s12   ;;  %s1554_s12 = sphi %s1625_s12, %s1952_s12   ;;  %s1550_s11 = sphi %s1623_s11, %s1954_s11   ;;  %s1546_s10 = sphi %s1621_s10, %s1956_s10   ;;  %s1542_s30 = sphi %s1619_s30, %s1955_s30  }
   0xc   : > { %s1118_s14 = sadd.s32 4294967294, %s1554_s12   ;;  %s1644_s15 = sadd.s32 1, %s1554_s12  }
   0xd   : > { %1944 = sst [smem:[#allocation19_spill]] %s1644_s15  ;;  %s214_s16 = sadd.s32 1, %s1550_s11 }
   0xe   : > { %s211_s17 = ssub.s32 %s1554_s12, %s1644_s15  ;;  %p224_p0 = scmp.ne.s32.totalorder %s1550_s11, %s1546_s10 }
   0xf   : > { %p212_p1 = scmp.eq.s32.totalorder %s211_s17, 0  ;;  %p225_p2 = scmp.eq.s32.totalorder %s1640_s13, 1 }
  0x10   : > { %p230_p3 = scmp.ne.s32.totalorder %s1546_s10, %s1542_s30  ;;  %p231_p4 = scmp.eq.s32.totalorder %s1118_s14, 1 }
  0x11   : > { %s1655_s18 = scalar_select %p212_p1, %s1550_s11, %s214_s16  }
  0x12   : > { %p1657_p5 = por %p225_p2, %p224_p0  ;;  %p1661_p6 = por %p231_p4, %p230_p3 }
  0x13   : > { %1945 = sst [smem:[#allocation20_spill]] %s1655_s18  ;;  %p1119_p7 = scmp.ge.s32.totalorder %s1554_s12, 1 }
  0x14   : > { %p264_p8 = scmp.lt.s32.totalorder %s1554_s12, 3  ;;  %p1231_p9 = scmp.eq.s32.totalorder %s1640_s13, 0 }
  0x15   : > { %s1949_s4 = sld [smem:[#allocation22_spill]]  ;;  %s1556_s29 = smov [#allocation5]  }
  0x16   : > { %p1668_p10 = pnand %p1119_p7, %p264_p8  ;;  %s1950_s3 = sld [smem:[#allocation21_spill]] }
  0x17   : > { %s294_s14 = sshll.u32 %s1556_s29, 4  ;;  %s1557_s16 = smov 128   ;;  %s295_s14 = int_to_ptr.vmem [resolvable:$true] %s294_s14 }
  0x18   : > { %p1211_p11 = pneg %p1668_p10  ;;  %s1558_s17 = smov 8  }
  0x19   : > { %s1559_s22 = smov [#allocation2]   ;;  %s323_s18 = sshll.u32 %s1935_s7, 4  ;;  %s324_s18 = int_to_ptr.hbm [resolvable:$true] %s323_s18 }
  0x1a   : > { %p1682_p12 = pnand %p1231_p9, %p1211_p11  ;;  %s280_s23 = sshll.u32 %s1559_s22, 4  ;;  %s281_s23 = int_to_ptr.vmem [resolvable:$true] %s280_s23 }
  0x1b   : > { %s292_s24 = sshll.u32 %s1949_s4, 4  ;;  %s1560_s11 = smov [#allocation7]   ;;  %s293_s24 = int_to_ptr.hbm [resolvable:$true] %s292_s24 }
  0x1c   : > { %s278_s27 = sshll.u32 %s1950_s3, 4  ;;  %s306_s3 = sshll.u32 %s1933_s5, 4  ;;  %s279_s27 = int_to_ptr.hbm [resolvable:$true] %s278_s27  ;;  %s307_s3 = int_to_ptr.hbm [resolvable:$true] %s306_s3 }
  0x1d   : > { %1217 = dma.hbm_to_vmem [thread:$0]  (!%p1682_p12), %s293_s24, 256, %s295_s14, [#allocation6], %s1557_s16, %s1557_s16, %s1558_s17  }
  0x1e   : > { %1214 = dma.hbm_to_vmem [thread:$0]  (!%p1682_p12), %s279_s27, 256, %s281_s23, [#allocation3], %s1557_s16, %s1557_s16, %s1558_s17  }
  0x1f   : > { %s308_s15 = sshll.u32 %s1560_s11, 4  ;;  %s1561_s24 = smov [#allocation8]   ;;  %s309_s15 = int_to_ptr.vmem [resolvable:$true] %s308_s15 }
  0x20   : > { %1220 = dma.hbm_to_vmem [thread:$0]  (!%p1682_p12), %s307_s3, 256, %s309_s15, [#allocation6], %s1557_s16, %s1557_s16, %s1558_s17  }
  0x21   : > { %s325_s14 = sshll.u32 %s1561_s24, 4  ;;  %s1562_s22 = smov 64   ;;  %s326_s14 = int_to_ptr.vmem [resolvable:$true] %s325_s14 }
  0x22   : > { %s1563_s25 = smov 4   ;;  %355 = sbr.rel (%p1668_p10) target bundleno = 921 (0x399), region = 52 }
  0x23   : > { %1223 = dma.hbm_to_vmem [thread:$0]  (!%p1682_p12), %s324_s18, 128, %s326_s14, [#allocation9], %s1562_s22, %s1562_s22, %s1563_s25  }
  0x27   : > { %1521 = dma.done.wait (%p1231_p9), [#allocation3], 256  }
  0x28   : > { %1523 = vsyncadd (%p1231_p9), [#allocation3], 4294967040 }
  0x29   : > { %1525 = dma.done.wait (%p1231_p9), [#allocation6], 512  }
  0x2a   : > { %1527 = vsyncadd (%p1231_p9), [#allocation6], 4294966784 }
  0x2b   : > { %1529 = dma.done.wait (%p1231_p9), [#allocation9], 128  }
  0x2c   : > { %1531 = vsyncadd (%p1231_p9), [#allocation9], 4294967168  ;;  %p415_p13 = scmp.lt.s32.totalorder %s1640_s13, 1  ;;  %v1564_v0 = vmov 0   ;;  %v434_v11 = vld [vmem:[%s1930_s2] sm:$0xff]  ;;  %v435_v12 = vld [vmem:[%s1930_s2 + $0x8] sm:$0xff] }
  0x2d   : > { %1286 = vset.pattern.permute.xlu1 %v1564_v0  ;;  %1285 = vset.pattern.permute.xlu0 %v1564_v0  ;;  %v1134_v15 = vld [vmem:[%s1930_s2 + $0x10] sm:$0xff]  ;;  %v1135_v16 = vld [vmem:[%s1930_s2 + $0x18] sm:$0xff]  ;;  %v439_v30 = vld [vmem:[#allocation2] sm:$0xff]  ;;  %vm543_vm0 = vcmask 130048   ;;  %s1565_s15 = smov 16   ;;  %s1822_s21 = sand.u32 1, %s1546_s10  }
  0x2e   : > { %s416_s3 = scalar_select %p415_p13, %s1640_s13, 1  ;;  %1287 = vset.pattern.permute.xlu2 %v1564_v0  ;;  %v1734_v18 = vld [vmem:[#allocation8] sm:$0xff]  ;;  %v440_v31 = vld [vmem:[#allocation2 + $0x8] sm:$0xff] }
  0x2f   : > { %557 = vmatpush.bf16.msra.mxu0 %v1734_v18  ;;  %1189 = vmatpush.bf16.msra.mxu2 %v1734_v18  ;;  %s1130_s27 = sshll.u32 %s1822_s21, 6  ;;  %s1186_s17 = sshll.u32 %s1640_s13, 6 }
  0x30   : > { %s1132_s4 = sshll.u32 %s416_s3, 2  ;;  %s1835_s16 = scalar_lea.vmem [#allocation11], %s1130_s27 }
  0x31   : > { %s418_s18 = scalar_lea.vmem %s1928_s0, %s1132_s4  ;;  %s422_s28 = scalar_lea.vmem %s1929_s1, %s1132_s4 }
  0x32   : > { %v1288_v1 = vld [vmem:[%s418_s18 + $0x2] ss:$0 sm:$0xff]  ;;  %v1289_v2 = vld [vmem:[%s418_s18] ss:$0 sm:$0xff]  ;;  %v1294_v3 = vld [vmem:[%s418_s18 + $0x1] ss:$0 sm:$0xff]  ;;  %s948_s29 = scalar_lea.hbm %s1936_s8, %s1186_s17 }
  0x33   : > { %706 = vperm.xlu1 %1286, %v1288_v1   ;;  %456 = vperm.xlu0 %1285, %v1289_v2   ;;  %v1290_v4 = vld [vmem:[%s422_s28 + $0x2] ss:$0 sm:$0xff]  ;;  %v1291_v5 = vld [vmem:[%s422_s28] ss:$0 sm:$0xff]  ;;  %v1295_v6 = vld [vmem:[%s422_s28 + $0x1] ss:$0 sm:$0xff] }
  0x34   : > { %460 = vperm.xlu2 %1287, %v1294_v3   ;;  %v1292_v7 = vld [vmem:[%s422_s28 + $0x3] ss:$0 sm:$0xff]  ;;  %s1826_s28 = scalar_lea.vmem [#allocation10], %s1130_s27  ;;  %s951_s14 = sshll.u32 %s948_s29, 4  ;;  %s952_s14 = int_to_ptr.hbm [resolvable:$true] %s951_s14 }
  0x35   : > { %v1293_v8 = vld [vmem:[%s418_s18 + $0x3] ss:$0 sm:$0xff]  ;;  %s1566_s18 = smov 112   ;;  %s949_s24 = sshll.u32 %s1826_s28, 4  ;;  %s950_s24 = int_to_ptr.vmem [resolvable:$true] %s949_s24 }
  0x36   : > { %s931_s22 = scalar_lea.sflag [#allocation4], %s1822_s21  ;;  %s1462_s25 = sshra.s32 %s952_s14, 4  ;;  %s1463_s25 = int_to_ptr.hbm [resolvable:$true] %s1462_s25 }
  0x37   : > { %s1464_s3 = scalar_lea.hbm %s1463_s25, 64  ;;  %p1469_p3 = scmp.lt.s32.totalorder %s1463_s25, %s1936_s8 }
  0x38   : > { %p1465_p0 = scmp.ne.s32.totalorder %s1463_s25, %s1464_s3 }
  0x3a   : > { %p1466_p1 = pnand %p1465_p0, %p1657_p5 }
  0x3b   : > { %722 = vperm.xlu1 %1286, %v1290_v4   ;;  %472 = vperm.xlu0 %1285, %v1291_v5  }
  0x3c   : > { %476 = vperm.xlu2 %1287, %v1295_v6   ;;  %p1467_p2 = pneg %p1466_p1 }
  0x43   : > { %726 = vperm.xlu1 %1286, %v1292_v7   ;;  %710 = vperm.xlu0 %1285, %v1293_v8  }
  0x8e   : > { %v461_v41 = vpop.permute.xlu2 %460 }
  0x8f   : > { %v465_v57 = vmul.f32 %v461_v41, %v434_v11  ;;  %v466_v59 = vmul.f32 %v461_v41, %v435_v12 }
  0x96   : > { %v477_v58 = vpop.permute.xlu2 %476 }
  0x97   : > { %v481_v60 = vmul.f32 %v1134_v15, %v477_v58  ;;  %v482_v61 = vmul.f32 %v1135_v16, %v477_v58 }
  0x99   : > { %v485_v1 = vadd.f32 %v481_v60, %v465_v57  ;;  %v486_v4 = vadd.f32 %v482_v61, %v466_v59 }
  0xa5   : > { %v707_v9 = vpop.permute.xlu1 %706  ;;  %v457_v10 = vpop.permute.xlu0 %456 }
  0xa6   : > { %v713_v13 = vmul.f32 %v707_v9, %v434_v11  ;;  %v714_v14 = vmul.f32 %v707_v9, %v435_v12  ;;  %v463_v19 = vmul.f32 %v457_v10, %v434_v11  ;;  %v464_v23 = vmul.f32 %v457_v10, %v435_v12 }
  0xa7   : > { %v489_v9 = vmul.f32 4.39, %v485_v1 }
  0xad   : > { %v723_v17 = vpop.permute.xlu1 %722  ;;  %v473_v22 = vpop.permute.xlu0 %472 }
  0xae   : > { %v729_v20 = vmul.f32 %v1134_v15, %v723_v17  ;;  %v730_v21 = vmul.f32 %v1135_v16, %v723_v17  ;;  %v479_v24 = vmul.f32 %v1134_v15, %v473_v22  ;;  %v480_v25 = vmul.f32 %v1135_v16, %v473_v22  ;;  %v1744_v22 = vld [vmem:[#allocation5 + $0x8] sm:$0xff] }
  0xb0   : > { %v733_v26 = vadd.f32 %v729_v20, %v713_v13  ;;  %v734_v27 = vadd.f32 %v730_v21, %v714_v14  ;;  %v483_v28 = vadd.f32 %v479_v24, %v463_v19  ;;  %v484_v29 = vadd.f32 %v480_v25, %v464_v23 }
  0xb2   : > { %v737_v32 = vmul.f32 4.39, %v733_v26  ;;  %v738_v33 = vmul.f32 4.39, %v734_v27  ;;  %v487_v34 = vmul.f32 4.39, %v483_v28 }
  0xb3   : > { %v488_v35 = vmul.f32 4.39, %v484_v29 }
  0xb4   : > { %v1738_v36 = vadd.f32 %v737_v32, %v439_v30  ;;  %v1740_v37 = vadd.f32 %v738_v33, %v440_v31  ;;  %v491_v38 = vadd.f32 %v487_v34, %v439_v30  ;;  %v1747_v32 = vld [vmem:[#allocation7] sm:$0xff]  ;;  %v1750_v34 = vld [vmem:[#allocation7 + $0x8] sm:$0xff] }
  0xb5   : > { %v492_v39 = vadd.f32 %v488_v35, %v440_v31  ;;  %v727_v40 = vpop.permute.xlu1 %726  ;;  %v711_v44 = vpop.permute.xlu0 %710 }
  0xb6   : > { %v731_v42 = vmul.f32 %v1134_v15, %v727_v40  ;;  %v732_v43 = vmul.f32 %v1135_v16, %v727_v40  ;;  %v495_v45 = vmul.f32 -0.006, %v491_v38  ;;  %v715_v47 = vmul.f32 %v711_v44, %v434_v11  ;;  %v1742_v16 = vld [vmem:[#allocation5] sm:$0xff] }
  0xb7   : > { %v496_v46 = vmul.f32 -0.006, %v492_v39  ;;  %v716_v48 = vmul.f32 %v711_v44, %v435_v12  ;;  %v490_v11 = vmul.f32 4.39, %v486_v4  ;;  %v493_v12 = vadd.f32 %v489_v9, %v439_v30 }
  0xb8   : > { %v499_v49 = vmul.f32 1.442695, %v495_v45  ;;  %v735_v51 = vadd.f32 %v731_v42, %v715_v47 }
  0xb9   : > { %v501_v50 = vmul.f32 1.442695, %v496_v46  ;;  %v736_v52 = vadd.f32 %v732_v43, %v716_v48  ;;  %v494_v14 = vadd.f32 %v490_v11, %v440_v31  ;;  %v497_v19 = vmul.f32 -0.006, %v493_v12 }
  0xba   : > { %v739_v53 = vmul.f32 4.39, %v735_v51  ;;  %1296 = vpow2.f32 %v499_v49 }
  0xbb   : > { %v740_v54 = vmul.f32 4.39, %v736_v52  ;;  %1298 = vpow2.f32 %v501_v50  ;;  %v498_v23 = vmul.f32 -0.006, %v494_v14  ;;  %v503_v25 = vmul.f32 1.442695, %v497_v19 }
  0xbc   : > { %v743_v55 = vadd.f32 %v739_v53, %v439_v30 }
  0xbd   : > { %v744_v56 = vadd.f32 %v740_v54, %v440_v31  ;;  %v505_v28 = vmul.f32 1.442695, %v498_v23 }
  0xbe   : > { %v747_v62 = vmul.f32 -0.006, %v743_v55 }
  0xbf   : > { %v748_v63 = vmul.f32 -0.006, %v744_v56 }
  0xc0   : > { %v753_v0 = vmul.f32 1.442695, %v747_v62  ;;  %v1297_v2 = vpop.eup %1296 }
  0xc1   : > { %v755_v3 = vmul.f32 1.442695, %v748_v63  ;;  %v1299_v5 = vpop.eup %1298  ;;  %v515_v6 = vmul.f32 0.9659258, %v1297_v2  ;;  %v507_v13 = vsub.f32 1.0, %v1297_v2 }
  0xc2   : > { %1300 = vpow2.f32 %v753_v0  ;;  %v516_v7 = vmul.f32 0.9659258, %v1299_v5  ;;  %v508_v17 = vsub.f32 1.0, %v1299_v5 }
  0xc3   : > { %1302 = vpow2.f32 %v755_v3  ;;  %v519_v8 = vsub.f32 1.0, %v515_v6  ;;  %v511_v27 = vmul.f32 %v507_v13, %v1742_v16  ;;  %v745_v6 = vmul.f32 -0.006, %v1738_v36 }
  0xc4   : > { %v520_v10 = vsub.f32 1.0, %v516_v7  ;;  %v512_v31 = vmul.f32 %v508_v17, %v1744_v22  ;;  %v746_v7 = vmul.f32 -0.006, %v1740_v37 }
  0xc5   : > { %1304 = vrcp.f32 %v519_v8  ;;  %v749_v8 = vmul.f32 1.442695, %v745_v6 }
  0xc6   : > { %1306 = vrcp.f32 %v520_v10  ;;  %v751_v9 = vmul.f32 1.442695, %v746_v7 }
  0xc7   : > { %1308 = vpow2.f32 %v503_v25 }
  0xc8   : > { %v1301_v15 = vpop.eup %1300  ;;  %1310 = vpow2.f32 %v505_v28 }
  0xc9   : > { %v1303_v20 = vpop.eup %1302  ;;  %v767_v21 = vmul.f32 0.9659258, %v1301_v15  ;;  %v759_v40 = vsub.f32 1.0, %v1301_v15 }
  0xca   : > { %v768_v24 = vmul.f32 0.9659258, %v1303_v20  ;;  %v760_v42 = vsub.f32 1.0, %v1303_v20 }
  0xcb   : > { %v771_v26 = vsub.f32 1.0, %v767_v21  ;;  %v1305_v29 = vpop.eup %1304  ;;  %v763_v47 = vmul.f32 %v759_v40, %v1742_v16 }
  0xcc   : > { %v772_v30 = vsub.f32 1.0, %v768_v24  ;;  %v1307_v33 = vpop.eup %1306  ;;  %v527_v35 = vmul.f32 %v1305_v29, %v511_v27  ;;  %v764_v50 = vmul.f32 %v760_v42, %v1744_v22 }
  0xcd   : > { %v528_v38 = vmul.f32 %v1307_v33, %v512_v31  ;;  %1312 = vrcp.f32 %v771_v26  ;;  %v1309_v43 = vpop.eup %1308 }
  0xce   : > { %v531_v39 = vadd.f32 %v527_v35, %v1747_v32  ;;  %1314 = vrcp.f32 %v772_v30  ;;  %v1311_v45 = vpop.eup %1310  ;;  %v517_v46 = vmul.f32 0.9659258, %v1309_v43  ;;  %v509_v55 = vsub.f32 1.0, %v1309_v43 }
  0xcf   : > { %v532_v41 = vadd.f32 %v528_v38, %v1750_v34  ;;  %v518_v49 = vmul.f32 0.9659258, %v1311_v45  ;;  %v510_v57 = vsub.f32 1.0, %v1311_v45 }
  0xd0   : > { %v521_v52 = vsub.f32 1.0, %v517_v46  ;;  %v513_v60 = vmul.f32 %v509_v55, %v1742_v16 }
  0xd1   : > { %v535_v44 = vpack.c.bf16 %v532_v41, %v531_v39  ;;  %v522_v54 = vsub.f32 1.0, %v518_v49  ;;  %v514_v62 = vmul.f32 %v510_v57, %v1744_v22 }
  0xd2   : > { %1316 = vrcp.f32 %v521_v52 }
  0xd3   : > { %v1313_v48 = vpop.eup %1312  ;;  %1140 = vmatmul.msk.bf16.vlgmr.msra.gmra.mxu0 %vm543_vm0, %v535_v44  ;;  %1318 = vrcp.f32 %v522_v54 }
  0xd4   : > { %v1315_v51 = vpop.eup %1314  ;;  %v779_v53 = vmul.f32 %v1313_v48, %v763_v47  ;;  %1320 = vpow2.f32 %v749_v8 }
  0xd5   : > { %v780_v56 = vmul.f32 %v1315_v51, %v764_v50  ;;  %1322 = vpow2.f32 %v751_v9 }
  0xd6   : > { %v1758_v58 = vadd.f32 %v779_v53, %v1747_v32 }
  0xd7   : > { %v784_v59 = vadd.f32 %v780_v56, %v1750_v34 }
  0xd8   : > { %v1317_v63 = vpop.eup %1316 }
  0xd9   : > { %v786_v61 = vpack.c.bf16 %v784_v59, %v1758_v58  ;;  %v1319_v0 = vpop.eup %1318  ;;  %v529_v1 = vmul.f32 %v1317_v63, %v513_v60 }
  0xda   : > { %v530_v2 = vmul.f32 %v1319_v0, %v514_v62  ;;  %v1321_v10 = vpop.eup %1320 }
  0xdb   : > { %v533_v3 = vadd.f32 %v529_v1, %v1747_v32  ;;  %v1323_v11 = vpop.eup %1322  ;;  %v765_v12 = vmul.f32 0.9659258, %v1321_v10  ;;  %v757_v17 = vsub.f32 1.0, %v1321_v10 }
  0xdc   : > { %v534_v4 = vadd.f32 %v530_v2, %v1750_v34  ;;  %v766_v13 = vmul.f32 0.9659258, %v1323_v11  ;;  %v758_v19 = vsub.f32 1.0, %v1323_v11 }
  0xdd   : > { %v769_v14 = vsub.f32 1.0, %v765_v12  ;;  %v761_v36 = vmul.f32 %v757_v17, %v1742_v16  ;;  %v1184_v16 = vld [vmem:[%s1934_s6 + $0x8] sm:$0xff] }
  0xde   : > { %v536_v5 = vpack.c.bf16 %v534_v4, %v533_v3  ;;  %v770_v15 = vsub.f32 1.0, %v766_v13  ;;  %v762_v37 = vmul.f32 %v758_v19, %v1744_v22  ;;  %v1183_v22 = vld [vmem:[%s1934_s6] sm:$0xff] }
  0xdf   : > { %1324 = vrcp.f32 %v769_v14 }
  0xe0   : > { %1141 = vmatmul.msk.bf16.vlgmr.msra.gmra.mxu2 %vm543_vm0, %v536_v5  ;;  %1326 = vrcp.f32 %v770_v15 }
  0xe5   : > { %v1325_v20 = vpop.eup %1324 }
  0xe6   : > { %v1327_v21 = vpop.eup %1326  ;;  %v777_v23 = vmul.f32 %v1325_v20, %v761_v36 }
  0xe7   : > { %v778_v24 = vmul.f32 %v1327_v21, %v762_v37 }
  0xe8   : > { %v781_v25 = vadd.f32 %v777_v23, %v1747_v32 }
  0xe9   : > { %v782_v26 = vadd.f32 %v778_v24, %v1750_v34 }
  0xeb   : > { %v785_v27 = vpack.c.bf16 %v782_v26, %v781_v25 }
 0x150   : > { %v559_v28 = vpop.f32.mrf.mxu0 }
 0x151   : > { %v569_v29 = vpack.c.bf16 %v559_v28, %v559_v28 }
 0x153   : > { %v585_v33 = vunpack.c.l.b16 %v569_v29 }
 0x158   : > { %v561_v30 = vpop.f32.mrf.mxu0 }
 0x159   : > { %v570_v31 = vpack.c.bf16 %v561_v30, %v561_v30 }
 0x15b   : > { %v586_v35 = vunpack.c.l.b16 %v570_v31 }
 0x15d   : > { %v587_v38 = vpack.c.b16 %v586_v35, %v585_v33 }
 0x15f   : > { %602 = vmatpush.bf16.msra.mxu1 %v587_v38  ;;  %1190 = vmatpush.bf16.msra.mxu3 %v587_v38 }
 0x162   : > { %1151 = vmatmul.msk.bf16.vlgmr.msra.gmra.mxu3 %vm543_vm0, %v1184_v16  ;;  %1150 = vmatmul.msk.bf16.vlgmr.msra.gmra.mxu1 %vm543_vm0, %v1183_v22 }
 0x163   : > { %800 = vmatpush.bf16.msrb.mxu3 %v1734_v18  ;;  %v564_v32 = vpop.f32.mrf.mxu2 }
 0x164   : > { %v571_v34 = vpack.c.bf16 %v564_v32, %v564_v32 }
 0x166   : > { %v646_v40 = vunpack.c.l.b16 %v571_v34 }
 0x16b   : > { %v566_v39 = vpop.f32.mrf.mxu2 }
 0x16c   : > { %v572_v41 = vpack.c.bf16 %v566_v39, %v566_v39 }
 0x16e   : > { %v647_v42 = vunpack.c.l.b16 %v572_v41 }
 0x170   : > { %v648_v43 = vpack.c.b16 %v647_v42, %v646_v40 }
 0x172   : > { %1158 = vmatmul.msk.bf16.vlgmr.msrb.gmra.mxu3 %vm543_vm0, %v785_v27  ;;  %657 = vmatpush.bf16.msrb.mxu2 %v648_v43 }
 0x175   : > { %1152 = vmatmul.msk.bf16.vlgmr.msrb.gmra.mxu2 %vm543_vm0, %v1183_v22 }
 0x182   : > { %1159 = vmatmul.msk.bf16.gmra.mxu3 %vm543_vm0, %v786_v61 }
 0x185   : > { %1153 = vmatmul.msk.bf16.gmra.mxu2 %vm543_vm0, %v1184_v16 }
 0x1df   : > { %v604_v63 = vpop.f32.mrf.mxu1 }
 0x1e5   : > { %v609_v18 = vpop.f32.mrf.mxu3 }
 0x1e6   : > { %626 = vrot.lane.b32.xlu2 %v609_v18, %s1565_s15 }
 0x1e7   : > { %v606_v1 = vpop.f32.mrf.mxu1 }
 0x1ed   : > { %v611_v44 = vpop.f32.mrf.mxu3 }
 0x1ee   : > { %628 = vrot.lane.b32.xlu0 %v611_v44, %s1565_s15 }
 0x1f5   : > { %v802_v45 = vpop.f32.mrf.mxu3 }
 0x1f6   : > { %v812_v46 = vpack.c.bf16 %v802_v45, %v802_v45 }
 0x1f8   : > { %v818_v49 = vunpack.c.l.b16 %v812_v46  ;;  %v1788_v51 = vpop.f32.mrf.mxu2 }
 0x1fd   : > { %v804_v47 = vpop.f32.mrf.mxu3 }
 0x1fe   : > { %v813_v48 = vpack.c.bf16 %v804_v47, %v804_v47 }
 0x200   : > { %v819_v50 = vunpack.c.l.b16 %v813_v48  ;;  %v1791_v54 = vpop.f32.mrf.mxu2 }
 0x202   : > { %v820_v52 = vpack.c.b16 %v819_v50, %v818_v49 }
 0x204   : > { %829 = vmatpush.bf16.msrb.mxu0 %v820_v52 }
 0x205   : > { %v807_v53 = vpop.f32.mrf.mxu3 }
 0x206   : > { %v814_v55 = vpack.c.bf16 %v807_v53, %v807_v53 }
 0x207   : > { %1160 = vmatmul.msk.bf16.vlgmr.msrb.gmra.mxu0 %vm543_vm0, %v1183_v22 }
 0x208   : > { %v875_v58 = vunpack.c.l.b16 %v814_v55  ;;  %v664_v60 = vpop.f32.mrf.mxu2 }
 0x209   : > { %682 = vrot.lane.b32.xlu1 %v664_v60, %s1565_s15 }
 0x20d   : > { %v809_v56 = vpop.f32.mrf.mxu3 }
 0x20e   : > { %v815_v57 = vpack.c.bf16 %v809_v56, %v809_v56 }
 0x210   : > { %v876_v59 = vunpack.c.l.b16 %v815_v57  ;;  %v666_v62 = vpop.f32.mrf.mxu2 }
 0x211   : > { %684 = vrot.lane.b32.xlu2 %v666_v62, %s1565_s15 }
 0x212   : > { %v877_v61 = vpack.c.b16 %v876_v59, %v875_v58 }
 0x214   : > { %886 = vmatpush.bf16.msrb.mxu1 %v877_v61 }
 0x217   : > { %1161 = vmatmul.msk.bf16.gmra.mxu0 %vm543_vm0, %v1184_v16  ;;  %1166 = vmatmul.msk.bf16.vlgmr.msrb.gmra.mxu1 %vm543_vm0, %v1183_v22 }
 0x227   : > { %1167 = vmatmul.msk.bf16.gmra.mxu1 %vm543_vm0, %v1184_v16 }
 0x240   : > { %v627_v13 = vpop.permute.xlu2 %626 }
 0x241   : > { %v632_v14 = vadd.f32 %v627_v13, %v604_v63 }
 0x260   : > { %v629_v9 = vpop.permute.xlu0 %628 }
 0x261   : > { %v633_v11 = vadd.f32 %v629_v9, %v606_v1 }
 0x26b   : > { %v685_v15 = vpop.permute.xlu2 %684 }
 0x26c   : > { %v689_v17 = vadd.f32 %v685_v15, %v1791_v54 }
 0x27b   : > { %v683_v10 = vpop.permute.xlu1 %682 }
 0x27c   : > { %v688_v12 = vadd.f32 %v683_v10, %v1788_v51 }
 0x284   : > { %v831_v0 = vpop.f32.mrf.mxu0 }
 0x28c   : > { %v1798_v2 = vpop.f32.mrf.mxu0 }
 0x294   : > { %v836_v3 = vpop.f32.mrf.mxu0  ;;  %v1800_v4 = vpop.f32.mrf.mxu1 }
 0x295   : > { %854 = vrot.lane.b32.xlu0 %v836_v3, %s1565_s15 }
 0x29c   : > { %v838_v5 = vpop.f32.mrf.mxu0  ;;  %v890_v6 = vpop.f32.mrf.mxu1 }
 0x29d   : > { %856 = vrot.lane.b32.xlu1 %v838_v5, %s1565_s15 }
 0x2a4   : > { %v893_v7 = vpop.f32.mrf.mxu1 }
 0x2a5   : > { %616 = vrot.lane.b32.xlu1 %v609_v18, %s1566_s18  ;;  %911 = vrot.lane.b32.xlu2 %v893_v7, %s1565_s15 }
 0x2ac   : > { %v895_v8 = vpop.f32.mrf.mxu1 }
 0x2ad   : > { %673 = vrot.lane.b32.xlu1 %v666_v62, %s1566_s18  ;;  %618 = vrot.lane.b32.xlu2 %v611_v44, %s1566_s18 }
 0x2ae   : > { %913 = vrot.lane.b32.xlu0 %v895_v8, %s1565_s15  ;;  %s1468_s15 = scalar_lea.hbm %s1936_s8, 128 }
 0x2af   : > { %p1470_p4 = scmp.lt.s32.totalorder %s1468_s15, %s1464_s3 }
 0x2b1   : > { %p1471_p7 = por %p1470_p4, %p1469_p3 }
 0x2b3   : > { %p1472_p8 = pnand %p1471_p7, %p1467_p2 }
 0x2b5   : > { %900 = vrot.lane.b32.xlu1 %v893_v7, %s1566_s18  ;;  %843 = vrot.lane.b32.xlu2 %v836_v3, %s1566_s18 }
 0x2b6   : > { %671 = vrot.lane.b32.xlu0 %v664_v60, %s1566_s18 }
 0x2bd   : > { %692 = vrot.lane.b32.xlu2 %v688_v12, %s1566_s18  ;;  %638 = vrot.lane.b32.xlu1 %v633_v11, %s1566_s18 }
 0x2be   : > { %845 = vrot.lane.b32.xlu0 %v838_v5, %s1566_s18 }
 0x2c5   : > { %902 = vrot.lane.b32.xlu2 %v895_v8, %s1566_s18 }
 0x2c6   : > { %636 = vrot.lane.b32.xlu0 %v632_v14, %s1566_s18 }
 0x2ce   : > { %694 = vrot.lane.b32.xlu0 %v689_v17, %s1566_s18 }
 0x2ff   : > { %v912_v19 = vpop.permute.xlu2 %911 }
 0x300   : > { %v917_v20 = vadd.f32 %v912_v19, %v1800_v4 }
 0x302   : > { %921 = vrot.lane.b32.xlu0 %v917_v20, %s1566_s18 }
 0x307   : > { %v619_v21 = vpop.permute.xlu2 %618  ;;  %v855_v36 = vpop.permute.xlu0 %854 }
 0x308   : > { %v623_v37 = vsub.f32 %v606_v1, %v619_v21  ;;  %v860_v23 = vadd.f32 %v855_v36, %v831_v0 }
 0x30a   : > { %625 = vst.msk [vmem:[%s1826_s28 + $0x8] sm:$0xff] %vm543_vm0, %v623_v37  ;;  %864 = vrot.lane.b32.xlu1 %v860_v23, %s1566_s18 }
 0x30f   : > { %v857_v24 = vpop.permute.xlu1 %856  ;;  %v844_v25 = vpop.permute.xlu2 %843 }
 0x310   : > { %v861_v26 = vadd.f32 %v857_v24, %v1798_v2  ;;  %v849_v27 = vsub.f32 %v831_v0, %v844_v25 }
 0x312   : > { %1162 = vst.msk [vmem:[%s1826_s28 + $0x20] sm:$0xff] %vm543_vm0, %v849_v27  ;;  %866 = vrot.lane.b32.xlu2 %v861_v26, %s1566_s18 }
 0x317   : > { %v617_v28 = vpop.permute.xlu1 %616  ;;  %v693_v29 = vpop.permute.xlu2 %692 }
 0x318   : > { %v622_v30 = vsub.f32 %v604_v63, %v617_v28  ;;  %1156 = vst.msk [vmem:[%s1835_s16 + $0x10] sm:$0xff] %vm543_vm0, %v693_v29 }
 0x31a   : > { %624 = vst.msk [vmem:[%s1826_s28] sm:$0xff] %vm543_vm0, %v622_v30 }
 0x31f   : > { %v674_v31 = vpop.permute.xlu1 %673  ;;  %v903_v33 = vpop.permute.xlu2 %902 }
 0x320   : > { %v678_v35 = vsub.f32 %v1791_v54, %v674_v31  ;;  %v907_v38 = vsub.f32 %v890_v6, %v903_v33  ;;  %v914_v16 = vpop.permute.xlu0 %913 }
 0x321   : > { %v918_v22 = vadd.f32 %v914_v16, %v890_v6 }
 0x322   : > { %1155 = vst.msk [vmem:[%s1826_s28 + $0x18] sm:$0xff] %vm543_vm0, %v678_v35 }
 0x323   : > { %1169 = vst.msk [vmem:[%s1826_s28 + $0x38] sm:$0xff] %vm543_vm0, %v907_v38  ;;  %923 = vrot.lane.b32.xlu1 %v918_v22, %s1566_s18 }
 0x327   : > { %v901_v32 = vpop.permute.xlu1 %900 }
 0x328   : > { %v906_v34 = vsub.f32 %v1800_v4, %v901_v32  ;;  %v672_v39 = vpop.permute.xlu0 %671 }
 0x329   : > { %v677_v40 = vsub.f32 %v1788_v51, %v672_v39 }
 0x32a   : > { %1168 = vst.msk [vmem:[%s1826_s28 + $0x30] sm:$0xff] %vm543_vm0, %v906_v34 }
 0x32b   : > { %1154 = vst.msk [vmem:[%s1826_s28 + $0x10] sm:$0xff] %vm543_vm0, %v677_v40 }
 0x32f   : > { %v639_v41 = vpop.permute.xlu1 %638 }
 0x330   : > { %643 = vst.msk [vmem:[%s1835_s16 + $0x8] sm:$0xff] %vm543_vm0, %v639_v41  ;;  %v846_v42 = vpop.permute.xlu0 %845 }
 0x331   : > { %v850_v43 = vsub.f32 %v1798_v2, %v846_v42 }
 0x333   : > { %1163 = vst.msk [vmem:[%s1826_s28 + $0x28] sm:$0xff] %vm543_vm0, %v850_v43 }
 0x334   : > { %1475 = shalt.err (!%p1472_p8)
}
 0x335   : > { %s1567_s28 = smov 128   ;;  %s1568_s23 = smov 8  }
 0x336   : > { %1207 = dma.vmem_to_hbm [thread:$0]  (%p1657_p5), %s950_s24, 1024, %s952_s14, %s931_s22, %s1567_s28, %s1567_s28, %s1568_s23  }
 0x337   : > { %s966_s24 = scalar_lea.hbm %s1937_s9, %s1186_s17  ;;  %s967_s14 = sshll.u32 %s1835_s16, 4  ;;  %s968_s14 = int_to_ptr.vmem [resolvable:$true] %s967_s14 }
 0x338   : > { %v637_v18 = vpop.permute.xlu0 %636  ;;  %s969_s22 = sshll.u32 %s966_s24, 4  ;;  %s936_s25 = scalar_lea.sflag [#allocation12], %s1822_s21  ;;  %s970_s22 = int_to_ptr.hbm [resolvable:$true] %s969_s22 }
 0x339   : > { %642 = vst.msk [vmem:[%s1835_s16] sm:$0xff] %vm543_vm0, %v637_v18  ;;  %s1490_s3 = sshra.s32 %s970_s22, 4  ;;  %s1496_s15 = scalar_lea.hbm %s1937_s9, 128  ;;  %s1491_s3 = int_to_ptr.hbm [resolvable:$true] %s1490_s3 }
 0x33a   : > { %s1492_s4 = scalar_lea.hbm %s1491_s3, 64  ;;  %p1497_p12 = scmp.lt.s32.totalorder %s1491_s3, %s1937_s9 }
 0x33b   : > { %p1493_p9 = scmp.ne.s32.totalorder %s1491_s3, %s1492_s4  ;;  %p1498_p13 = scmp.lt.s32.totalorder %s1496_s15, %s1492_s4 }
 0x33d   : > { %p1494_p10 = pnand %p1493_p9, %p1657_p5  ;;  %p1499_p0 = por %p1498_p13, %p1497_p12 }
 0x33f   : > { %p1495_p11 = pneg %p1494_p10 }
 0x340   : > { %v695_v44 = vpop.permute.xlu0 %694 }
 0x341   : > { %1157 = vst.msk [vmem:[%s1835_s16 + $0x18] sm:$0xff] %vm543_vm0, %v695_v44  ;;  %p1500_p1 = pnand %p1499_p0, %p1495_p11 }
 0x36c   : > { %v867_v45 = vpop.permute.xlu2 %866 }
 0x36d   : > { %1165 = vst.msk [vmem:[%s1835_s16 + $0x28] sm:$0xff] %vm543_vm0, %v867_v45 }
 0x374   : > { %v922_v46 = vpop.permute.xlu0 %921 }
 0x375   : > { %1170 = vst.msk [vmem:[%s1835_s16 + $0x30] sm:$0xff] %vm543_vm0, %v922_v46 }
 0x37c   : > { %v865_v47 = vpop.permute.xlu1 %864 }
 0x37d   : > { %1164 = vst.msk [vmem:[%s1835_s16 + $0x20] sm:$0xff] %vm543_vm0, %v865_v47 }
 0x395   : > { %v924_v48 = vpop.permute.xlu1 %923 }
 0x396   : > { %1171 = vst.msk [vmem:[%s1835_s16 + $0x38] sm:$0xff] %vm543_vm0, %v924_v48 }
 0x397   : > { %1503 = shalt.err (!%p1500_p1)
}
 0x398   : > { %1208 = dma.vmem_to_hbm [thread:$0]  (%p1657_p5), %s968_s14, 1024, %s970_s22, %s936_s25, %s1567_s28, %s1567_s28, %s1568_s23  }
 0x399 PF: > { %p1239_p2 = scmp.ge.s32.totalorder %s1554_s12, 2  ;;  %s984_s21 = sand.u32 1, %s1542_s30  }
 0x39a   : > { %s985_s16 = scalar_lea.sflag [#allocation4], %s984_s21 }
 0x39b   : > { %p1225_p3 = pnand %p1239_p2, %p1661_p6 }
 0x39d   : > { %p1226_p4 = pneg %p1225_p3 }
 0x39f   : > { %1533 = dma.done.wait (%p1226_p4), %s985_s16, 1024  }
 0x3a0   : > { %1535 = vsyncadd (%p1226_p4), %s985_s16, 4294966272  ;;  %s995_s27 = scalar_lea.sflag [#allocation12], %s984_s21 }
 0x3a1   : > { %1537 = dma.done.wait (%p1226_p4), %s995_s27, 1024  }
 0x3a2   : > { %1539 = vsyncadd (%p1226_p4), %s995_s27, 4294966272  ;;  %s1952_s12 = sld [smem:[#allocation19_spill]]  ;;  %s1955_s30 = smov %s1546_s10 }
 0x3a3   : > { %s1953_s19 = sld [smem:[#allocation18_spill]] }
 0x3a4   : > { %s1954_s11 = sld [smem:[#allocation20_spill]] }
 0x3a8   : > { %p26_p5 = scmp.ge.s32.totalorder %s1952_s12, 4  }
 0x3a9   : > { %s1956_s10 = smov %s1953_s19 }
 0x3aa   :  { %28 = sbr.rel (!%p26_p5) target bundleno = 11 (0xb), region = 131 }
 0x3af   :  { %1001 = vsyncpa [#allocation3], 1 }
 0x3b0   :  { %1003 = vsyncpa [#allocation3 + $0x1], 1 }
 0x3b1   :  { %1004 = vsyncpa [#allocation6], 1 }
 0x3b2   :  { %1005 = vsyncpa [#allocation9], 1 }
 0x3b3   :  { %1006 = vsyncpa [#allocation4], 1 }
 0x3b4   :  { %1008 = vsyncpa [#allocation4 + $0x1], 1 }
 0x3b5   :  { %1009 = vsyncpa [#allocation12], 1 }
 0x3b6   :  { %1011 = vsyncpa [#allocation12 + $0x1], 1 }

// kernel: tpu_custom_call.1
= control target key start
LH: loop header
LB: loop body
LE: loop exit
PB: predicated region body
PF: predicated region fallthrough
CT: control target
= control target key end

     0   :  { %s1928_s0 = inlined_call_operand.vmem [shape: f32[2,4,1,1], index: 0, kind: input, shape index: {}]   ;;  %s1929_s1 = inlined_call_operand.vmem [shape: f32[2,4,1,1], index: 1, kind: input, shape index: {}]   ;;  %s1930_s2 = inlined_call_operand.vmem [shape: f32[2,16,16], index: 2, kind: input, shape index: {}]   ;;  %s1931_s3 = inlined_call_operand.hbm [shape: f32[16,16], index: 3, kind: input, shape index: {}]   ;;  %s1932_s4 = inlined_call_operand.hbm [shape: f32[16,16], index: 4, kind: input, shape index: {}]   ;;  %s1933_s5 = inlined_call_operand.hbm [shape: f32[16,16], index: 5, kind: input, shape index: {}]   ;;  %s1934_s6 = inlined_call_operand.vmem [shape: bf16[32,16], index: 6, kind: input, shape index: {}]   ;;  %s1935_s7 = inlined_call_operand.hbm [shape: bf16[16,32], index: 7, kind: input, shape index: {}]   ;;  %s1936_s8 = inlined_call_operand.hbm [shape: f32[8,16,16], index: 8, kind: output, shape index: {0}]   ;;  %s1937_s9 = inlined_call_operand.hbm [shape: f32[8,16,16], index: 9, kind: output, shape index: {1}]  }
   0x1   :  { %1941 = sst [smem:[#allocation21_spill]] %s1931_s3 }
   0x2   :  { %1942 = sst [smem:[#allocation22_spill]] %s1932_s4 }
   0x3   :  { %15 = vsyncpa [#allocation3], 0 }
   0x4   :  { %16 = vsyncpa [#allocation6], 0 }
   0x5   :  { %17 = vsyncpa [#allocation9], 0 }
   0x6   :  { %18 = vsyncpa [#allocation4], 0 }
   0x7   :  { %20 = vsyncpa [#allocation4 + $0x1], 0 }
   0x8   :  { %21 = vsyncpa [#allocation12], 0 }
   0x9   :  { %23 = vsyncpa [#allocation12 + $0x1], 0  ;;  %s1619_s30 = smov 0   ;;  %s1621_s10 = smov 0  }
   0xa   :  { %s1623_s11 = smov 0   ;;  %s1625_s12 = smov 0  }
   0xb LB: > { %1943 = sst [smem:[#allocation18_spill]] %s1550_s11  ;;  %s1640_s13 = sadd.s32 4294967295, %s1554_s12   ;;  %s1554_s12 = sphi %s1625_s12, %s1952_s12   ;;  %s1550_s11 = sphi %s1623_s11, %s1954_s11   ;;  %s1546_s10 = sphi %s1621_s10, %s1956_s10   ;;  %s1542_s30 = sphi %s1619_s30, %s1955_s30  }
   0xc   : > { %s1118_s14 = sadd.s32 4294967294, %s1554_s12   ;;  %s1644_s15 = sadd.s32 1, %s1554_s12  }
   0xd   : > { %1944 = sst [smem:[#allocation19_spill]] %s1644_s15  ;;  %s214_s16 = sadd.s32 1, %s1550_s11 }
   0xe   : > { %s211_s17 = ssub.s32 %s1554_s12, %s1644_s15  ;;  %p224_p0 = scmp.ne.s32.totalorder %s1550_s11, %s1546_s10 }
   0xf   : > { %p212_p1 = scmp.eq.s32.totalorder %s211_s17, 0  ;;  %p225_p2 = scmp.eq.s32.totalorder %s1640_s13, 1 }
  0x10   : > { %p230_p3 = scmp.ne.s32.totalorder %s1546_s10, %s1542_s30  ;;  %p231_p4 = scmp.eq.s32.totalorder %s1118_s14, 1 }
  0x11   : > { %s1655_s18 = scalar_select %p212_p1, %s1550_s11, %s214_s16  }
  0x12   : > { %p1657_p5 = por %p225_p2, %p224_p0  ;;  %p1661_p6 = por %p231_p4, %p230_p3 }
  0x13   : > { %1945 = sst [smem:[#allocation20_spill]] %s1655_s18  ;;  %p1119_p7 = scmp.ge.s32.totalorder %s1554_s12, 1 }
  0x14   : > { %p264_p8 = scmp.lt.s32.totalorder %s1554_s12, 3  ;;  %p1231_p9 = scmp.eq.s32.totalorder %s1640_s13, 0 }
  0x15   : > { %s1949_s4 = sld [smem:[#allocation22_spill]]  ;;  %s1556_s29 = smov [#allocation5]  }
  0x16   : > { %p1668_p10 = pnand %p1119_p7, %p264_p8  ;;  %s1950_s3 = sld [smem:[#allocation21_spill]] }
  0x17   : > { %s294_s14 = sshll.u32 %s1556_s29, 4  ;;  %s1557_s16 = smov 128   ;;  %s295_s14 = int_to_ptr.vmem [resolvable:$true] %s294_s14 }
  0x18   : > { %p1211_p11 = pneg %p1668_p10  ;;  %s1558_s17 = smov 8  }
  0x19   : > { %s1559_s22 = smov [#allocation2]   ;;  %s323_s18 = sshll.u32 %s1935_s7, 4  ;;  %s324_s18 = int_to_ptr.hbm [resolvable:$true] %s323_s18 }
  0x1a   : > { %p1682_p12 = pnand %p1231_p9, %p1211_p11  ;;  %s280_s23 = sshll.u32 %s1559_s22, 4  ;;  %s281_s23 = int_to_ptr.vmem [resolvable:$true] %s280_s23 }
  0x1b   : > { %s292_s24 = sshll.u32 %s1949_s4, 4  ;;  %s1560_s11 = smov [#allocation7]   ;;  %s293_s24 = int_to_ptr.hbm [resolvable:$true] %s292_s24 }
  0x1c   : > { %s278_s27 = sshll.u32 %s1950_s3, 4  ;;  %s306_s3 = sshll.u32 %s1933_s5, 4  ;;  %s279_s27 = int_to_ptr.hbm [resolvable:$true] %s278_s27  ;;  %s307_s3 = int_to_ptr.hbm [resolvable:$true] %s306_s3 }
  0x1d   : > { %1217 = dma.hbm_to_vmem [thread:$0]  (!%p1682_p12), %s293_s24, 256, %s295_s14, [#allocation6], %s1557_s16, %s1557_s16, %s1558_s17  }
  0x1e   : > { %1214 = dma.hbm_to_vmem [thread:$0]  (!%p1682_p12), %s279_s27, 256, %s281_s23, [#allocation3], %s1557_s16, %s1557_s16, %s1558_s17  }
  0x1f   : > { %s308_s15 = sshll.u32 %s1560_s11, 4  ;;  %s1561_s24 = smov [#allocation8]   ;;  %s309_s15 = int_to_ptr.vmem [resolvable:$true] %s308_s15 }
  0x20   : > { %1220 = dma.hbm_to_vmem [thread:$0]  (!%p1682_p12), %s307_s3, 256, %s309_s15, [#allocation6], %s1557_s16, %s1557_s16, %s1558_s17  }
  0x21   : > { %s325_s14 = sshll.u32 %s1561_s24, 4  ;;  %s1562_s22 = smov 64   ;;  %s326_s14 = int_to_ptr.vmem [resolvable:$true] %s325_s14 }
  0x22   : > { %s1563_s25 = smov 4   ;;  %355 = sbr.rel (%p1668_p10) target bundleno = 921 (0x399), region = 52 }
  0x23   : > { %1223 = dma.hbm_to_vmem [thread:$0]  (!%p1682_p12), %s324_s18, 128, %s326_s14, [#allocation9], %s1562_s22, %s1562_s22, %s1563_s25  }
  0x27   : > { %1521 = dma.done.wait (%p1231_p9), [#allocation3], 256  }
  0x28   : > { %1523 = vsyncadd (%p1231_p9), [#allocation3], 4294967040 }
  0x29   : > { %1525 = dma.done.wait (%p1231_p9), [#allocation6], 512  }
  0x2a   : > { %1527 = vsyncadd (%p1231_p9), [#allocation6], 4294966784 }
  0x2b   : > { %1529 = dma.done.wait (%p1231_p9), [#allocation9], 128  }
  0x2c   : > { %1531 = vsyncadd (%p1231_p9), [#allocation9], 4294967168  ;;  %p415_p13 = scmp.lt.s32.totalorder %s1640_s13, 1  ;;  %v1564_v0 = vmov 0   ;;  %v434_v11 = vld [vmem:[%s1930_s2] sm:$0xff]  ;;  %v435_v12 = vld [vmem:[%s1930_s2 + $0x8] sm:$0xff] }
  0x2d   : > { %1286 = vset.pattern.permute.xlu1 %v1564_v0  ;;  %1285 = vset.pattern.permute.xlu0 %v1564_v0  ;;  %v1134_v15 = vld [vmem:[%s1930_s2 + $0x10] sm:$0xff]  ;;  %v1135_v16 = vld [vmem:[%s1930_s2 + $0x18] sm:$0xff]  ;;  %v439_v30 = vld [vmem:[#allocation2] sm:$0xff]  ;;  %vm543_vm0 = vcmask 130048   ;;  %s1565_s15 = smov 16   ;;  %s1822_s21 = sand.u32 1, %s1546_s10  }
  0x2e   : > { %s416_s3 = scalar_select %p415_p13, %s1640_s13, 1  ;;  %1287 = vset.pattern.permute.xlu2 %v1564_v0  ;;  %v1734_v18 = vld [vmem:[#allocation8] sm:$0xff]  ;;  %v440_v31 = vld [vmem:[#allocation2 + $0x8] sm:$0xff] }
  0x2f   : > { %557 = vmatpush.bf16.msra.mxu0 %v1734_v18  ;;  %1189 = vmatpush.bf16.msra.mxu2 %v1734_v18  ;;  %s1130_s27 = sshll.u32 %s1822_s21, 6  ;;  %s1186_s17 = sshll.u32 %s1640_s13, 6 }
  0x30   : > { %s1132_s4 = sshll.u32 %s416_s3, 2  ;;  %s1835_s16 = scalar_lea.vmem [#allocation11], %s1130_s27 }
  0x31   : > { %s418_s18 = scalar_lea.vmem %s1928_s0, %s1132_s4  ;;  %s422_s28 = scalar_lea.vmem %s1929_s1, %s1132_s4 }
  0x32   : > { %v1288_v1 = vld [vmem:[%s418_s18 + $0x2] ss:$0 sm:$0xff]  ;;  %v1289_v2 = vld [vmem:[%s418_s18] ss:$0 sm:$0xff]  ;;  %v1294_v3 = vld [vmem:[%s418_s18 + $0x1] ss:$0 sm:$0xff]  ;;  %s948_s29 = scalar_lea.hbm %s1936_s8, %s1186_s17 }
  0x33   : > { %706 = vperm.xlu1 %1286, %v1288_v1   ;;  %456 = vperm.xlu0 %1285, %v1289_v2   ;;  %v1290_v4 = vld [vmem:[%s422_s28 + $0x2] ss:$0 sm:$0xff]  ;;  %v1291_v5 = vld [vmem:[%s422_s28] ss:$0 sm:$0xff]  ;;  %v1295_v6 = vld [vmem:[%s422_s28 + $0x1] ss:$0 sm:$0xff] }
  0x34   : > { %460 = vperm.xlu2 %1287, %v1294_v3   ;;  %v1292_v7 = vld [vmem:[%s422_s28 + $0x3] ss:$0 sm:$0xff]  ;;  %s1826_s28 = scalar_lea.vmem [#allocation10], %s1130_s27  ;;  %s951_s14 = sshll.u32 %s948_s29, 4  ;;  %s952_s14 = int_to_ptr.hbm [resolvable:$true] %s951_s14 }
  0x35   : > { %v1293_v8 = vld [vmem:[%s418_s18 + $0x3] ss:$0 sm:$0xff]  ;;  %s1566_s18 = smov 112   ;;  %s949_s24 = sshll.u32 %s1826_s28, 4  ;;  %s950_s24 = int_to_ptr.vmem [resolvable:$true] %s949_s24 }
  0x36   : > { %s931_s22 = scalar_lea.sflag [#allocation4], %s1822_s21  ;;  %s1462_s25 = sshra.s32 %s952_s14, 4  ;;  %s1463_s25 = int_to_ptr.hbm [resolvable:$true] %s1462_s25 }
  0x37   : > { %s1464_s3 = scalar_lea.hbm %s1463_s25, 64  ;;  %p1469_p3 = scmp.lt.s32.totalorder %s1463_s25, %s1936_s8 }
  0x38   : > { %p1465_p0 = scmp.ne.s32.totalorder %s1463_s25, %s1464_s3 }
  0x3a   : > { %p1466_p1 = pnand %p1465_p0, %p1657_p5 }
  0x3b   : > { %722 = vperm.xlu1 %1286, %v1290_v4   ;;  %472 = vperm.xlu0 %1285, %v1291_v5  }
  0x3c   : > { %476 = vperm.xlu2 %1287, %v1295_v6   ;;  %p1467_p2 = pneg %p1466_p1 }
  0x43   : > { %726 = vperm.xlu1 %1286, %v1292_v7   ;;  %710 = vperm.xlu0 %1285, %v1293_v8  }
  0x8e   : > { %v461_v41 = vpop.permute.xlu2 %460 }
  0x8f   : > { %v465_v57 = vmul.f32 %v461_v41, %v434_v11  ;;  %v466_v59 = vmul.f32 %v461_v41, %v435_v12 }
  0x96   : > { %v477_v58 = vpop.permute.xlu2 %476 }
  0x97   : > { %v481_v60 = vmul.f32 %v1134_v15, %v477_v58  ;;  %v482_v61 = vmul.f32 %v1135_v16, %v477_v58 }
  0x99   : > { %v485_v1 = vadd.f32 %v481_v60, %v465_v57  ;;  %v486_v4 = vadd.f32 %v482_v61, %v466_v59 }
  0xa5   : > { %v707_v9 = vpop.permute.xlu1 %706  ;;  %v457_v10 = vpop.permute.xlu0 %456 }
  0xa6   : > { %v713_v13 = vmul.f32 %v707_v9, %v434_v11  ;;  %v714_v14 = vmul.f32 %v707_v9, %v435_v12  ;;  %v463_v19 = vmul.f32 %v457_v10, %v434_v11  ;;  %v464_v23 = vmul.f32 %v457_v10, %v435_v12 }
  0xa7   : > { %v489_v9 = vmul.f32 4.39, %v485_v1 }
  0xad   : > { %v723_v17 = vpop.permute.xlu1 %722  ;;  %v473_v22 = vpop.permute.xlu0 %472 }
  0xae   : > { %v729_v20 = vmul.f32 %v1134_v15, %v723_v17  ;;  %v730_v21 = vmul.f32 %v1135_v16, %v723_v17  ;;  %v479_v24 = vmul.f32 %v1134_v15, %v473_v22  ;;  %v480_v25 = vmul.f32 %v1135_v16, %v473_v22  ;;  %v1744_v22 = vld [vmem:[#allocation5 + $0x8] sm:$0xff] }
  0xb0   : > { %v733_v26 = vadd.f32 %v729_v20, %v713_v13  ;;  %v734_v27 = vadd.f32 %v730_v21, %v714_v14  ;;  %v483_v28 = vadd.f32 %v479_v24, %v463_v19  ;;  %v484_v29 = vadd.f32 %v480_v25, %v464_v23 }
  0xb2   : > { %v737_v32 = vmul.f32 4.39, %v733_v26  ;;  %v738_v33 = vmul.f32 4.39, %v734_v27  ;;  %v487_v34 = vmul.f32 4.39, %v483_v28 }
  0xb3   : > { %v488_v35 = vmul.f32 4.39, %v484_v29 }
  0xb4   : > { %v1738_v36 = vadd.f32 %v737_v32, %v439_v30  ;;  %v1740_v37 = vadd.f32 %v738_v33, %v440_v31  ;;  %v491_v38 = vadd.f32 %v487_v34, %v439_v30  ;;  %v1747_v32 = vld [vmem:[#allocation7] sm:$0xff]  ;;  %v1750_v34 = vld [vmem:[#allocation7 + $0x8] sm:$0xff] }
  0xb5   : > { %v492_v39 = vadd.f32 %v488_v35, %v440_v31  ;;  %v727_v40 = vpop.permute.xlu1 %726  ;;  %v711_v44 = vpop.permute.xlu0 %710 }
  0xb6   : > { %v731_v42 = vmul.f32 %v1134_v15, %v727_v40  ;;  %v732_v43 = vmul.f32 %v1135_v16, %v727_v40  ;;  %v495_v45 = vmul.f32 -0.006, %v491_v38  ;;  %v715_v47 = vmul.f32 %v711_v44, %v434_v11  ;;  %v1742_v16 = vld [vmem:[#allocation5] sm:$0xff] }
  0xb7   : > { %v496_v46 = vmul.f32 -0.006, %v492_v39  ;;  %v716_v48 = vmul.f32 %v711_v44, %v435_v12  ;;  %v490_v11 = vmul.f32 4.39, %v486_v4  ;;  %v493_v12 = vadd.f32 %v489_v9, %v439_v30 }
  0xb8   : > { %v499_v49 = vmul.f32 1.442695, %v495_v45  ;;  %v735_v51 = vadd.f32 %v731_v42, %v715_v47 }
  0xb9   : > { %v501_v50 = vmul.f32 1.442695, %v496_v46  ;;  %v736_v52 = vadd.f32 %v732_v43, %v716_v48  ;;  %v494_v14 = vadd.f32 %v490_v11, %v440_v31  ;;  %v497_v19 = vmul.f32 -0.006, %v493_v12 }
  0xba   : > { %v739_v53 = vmul.f32 4.39, %v735_v51  ;;  %1296 = vpow2.f32 %v499_v49 }
  0xbb   : > { %v740_v54 = vmul.f32 4.39, %v736_v52  ;;  %1298 = vpow2.f32 %v501_v50  ;;  %v498_v23 = vmul.f32 -0.006, %v494_v14  ;;  %v503_v25 = vmul.f32 1.442695, %v497_v19 }
  0xbc   : > { %v743_v55 = vadd.f32 %v739_v53, %v439_v30 }
  0xbd   : > { %v744_v56 = vadd.f32 %v740_v54, %v440_v31  ;;  %v505_v28 = vmul.f32 1.442695, %v498_v23 }
  0xbe   : > { %v747_v62 = vmul.f32 -0.006, %v743_v55 }
  0xbf   : > { %v748_v63 = vmul.f32 -0.006, %v744_v56 }
  0xc0   : > { %v753_v0 = vmul.f32 1.442695, %v747_v62  ;;  %v1297_v2 = vpop.eup %1296 }
  0xc1   : > { %v755_v3 = vmul.f32 1.442695, %v748_v63  ;;  %v1299_v5 = vpop.eup %1298  ;;  %v515_v6 = vmul.f32 0.9659258, %v1297_v2  ;;  %v507_v13 = vsub.f32 1.0, %v1297_v2 }
  0xc2   : > { %1300 = vpow2.f32 %v753_v0  ;;  %v516_v7 = vmul.f32 0.9659258, %v1299_v5  ;;  %v508_v17 = vsub.f32 1.0, %v1299_v5 }
  0xc3   : > { %1302 = vpow2.f32 %v755_v3  ;;  %v519_v8 = vsub.f32 1.0, %v515_v6  ;;  %v511_v27 = vmul.f32 %v507_v13, %v1742_v16  ;;  %v745_v6 = vmul.f32 -0.006, %v1738_v36 }
  0xc4   : > { %v520_v10 = vsub.f32 1.0, %v516_v7  ;;  %v512_v31 = vmul.f32 %v508_v17, %v1744_v22  ;;  %v746_v7 = vmul.f32 -0.006, %v1740_v37 }
  0xc5   : > { %1304 = vrcp.f32 %v519_v8  ;;  %v749_v8 = vmul.f32 1.442695, %v745_v6 }
  0xc6   : > { %1306 = vrcp.f32 %v520_v10  ;;  %v751_v9 = vmul.f32 1.442695, %v746_v7 }
  0xc7   : > { %1308 = vpow2.f32 %v503_v25 }
  0xc8   : > { %v1301_v15 = vpop.eup %1300  ;;  %1310 = vpow2.f32 %v505_v28 }
  0xc9   : > { %v1303_v20 = vpop.eup %1302  ;;  %v767_v21 = vmul.f32 0.9659258, %v1301_v15  ;;  %v759_v40 = vsub.f32 1.0, %v1301_v15 }
  0xca   : > { %v768_v24 = vmul.f32 0.9659258, %v1303_v20  ;;  %v760_v42 = vsub.f32 1.0, %v1303_v20 }
  0xcb   : > { %v771_v26 = vsub.f32 1.0, %v767_v21  ;;  %v1305_v29 = vpop.eup %1304  ;;  %v763_v47 = vmul.f32 %v759_v40, %v1742_v16 }
  0xcc   : > { %v772_v30 = vsub.f32 1.0, %v768_v24  ;;  %v1307_v33 = vpop.eup %1306  ;;  %v527_v35 = vmul.f32 %v1305_v29, %v511_v27  ;;  %v764_v50 = vmul.f32 %v760_v42, %v1744_v22 }
  0xcd   : > { %v528_v38 = vmul.f32 %v1307_v33, %v512_v31  ;;  %1312 = vrcp.f32 %v771_v26  ;;  %v1309_v43 = vpop.eup %1308 }
  0xce   : > { %v531_v39 = vadd.f32 %v527_v35, %v1747_v32  ;;  %1314 = vrcp.f32 %v772_v30  ;;  %v1311_v45 = vpop.eup %1310  ;;  %v517_v46 = vmul.f32 0.9659258, %v1309_v43  ;;  %v509_v55 = vsub.f32 1.0, %v1309_v43 }
  0xcf   : > { %v532_v41 = vadd.f32 %v528_v38, %v1750_v34  ;;  %v518_v49 = vmul.f32 0.9659258, %v1311_v45  ;;  %v510_v57 = vsub.f32 1.0, %v1311_v45 }
  0xd0   : > { %v521_v52 = vsub.f32 1.0, %v517_v46  ;;  %v513_v60 = vmul.f32 %v509_v55, %v1742_v16 }
  0xd1   : > { %v535_v44 = vpack.c.bf16 %v532_v41, %v531_v39  ;;  %v522_v54 = vsub.f32 1.0, %v518_v49  ;;  %v514_v62 = vmul.f32 %v510_v57, %v1744_v22 }
  0xd2   : > { %1316 = vrcp.f32 %v521_v52 }
  0xd3   : > { %v1313_v48 = vpop.eup %1312  ;;  %1140 = vmatmul.msk.bf16.vlgmr.msra.gmra.mxu0 %vm543_vm0, %v535_v44  ;;  %1318 = vrcp.f32 %v522_v54 }
  0xd4   : > { %v1315_v51 = vpop.eup %1314  ;;  %v779_v53 = vmul.f32 %v1313_v48, %v763_v47  ;;  %1320 = vpow2.f32 %v749_v8 }
  0xd5   : > { %v780_v56 = vmul.f32 %v1315_v51, %v764_v50  ;;  %1322 = vpow2.f32 %v751_v9 }
  0xd6   : > { %v1758_v58 = vadd.f32 %v779_v53, %v1747_v32 }
  0xd7   : > { %v784_v59 = vadd.f32 %v780_v56, %v1750_v34 }
  0xd8   : > { %v1317_v63 = vpop.eup %1316 }
  0xd9   : > { %v786_v61 = vpack.c.bf16 %v784_v59, %v1758_v58  ;;  %v1319_v0 = vpop.eup %1318  ;;  %v529_v1 = vmul.f32 %v1317_v63, %v513_v60 }
  0xda   : > { %v530_v2 = vmul.f32 %v1319_v0, %v514_v62  ;;  %v1321_v10 = vpop.eup %1320 }
  0xdb   : > { %v533_v3 = vadd.f32 %v529_v1, %v1747_v32  ;;  %v1323_v11 = vpop.eup %1322  ;;  %v765_v12 = vmul.f32 0.9659258, %v1321_v10  ;;  %v757_v17 = vsub.f32 1.0, %v1321_v10 }
  0xdc   : > { %v534_v4 = vadd.f32 %v530_v2, %v1750_v34  ;;  %v766_v13 = vmul.f32 0.9659258, %v1323_v11  ;;  %v758_v19 = vsub.f32 1.0, %v1323_v11 }
  0xdd   : > { %v769_v14 = vsub.f32 1.0, %v765_v12  ;;  %v761_v36 = vmul.f32 %v757_v17, %v1742_v16  ;;  %v1184_v16 = vld [vmem:[%s1934_s6 + $0x8] sm:$0xff] }
  0xde   : > { %v536_v5 = vpack.c.bf16 %v534_v4, %v533_v3  ;;  %v770_v15 = vsub.f32 1.0, %v766_v13  ;;  %v762_v37 = vmul.f32 %v758_v19, %v1744_v22  ;;  %v1183_v22 = vld [vmem:[%s1934_s6] sm:$0xff] }
  0xdf   : > { %1324 = vrcp.f32 %v769_v14 }
  0xe0   : > { %1141 = vmatmul.msk.bf16.vlgmr.msra.gmra.mxu2 %vm543_vm0, %v536_v5  ;;  %1326 = vrcp.f32 %v770_v15 }
  0xe5   : > { %v1325_v20 = vpop.eup %1324 }
  0xe6   : > { %v1327_v21 = vpop.eup %1326  ;;  %v777_v23 = vmul.f32 %v1325_v20, %v761_v36 }
  0xe7   : > { %v778_v24 = vmul.f32 %v1327_v21, %v762_v37 }
  0xe8   : > { %v781_v25 = vadd.f32 %v777_v23, %v1747_v32 }
  0xe9   : > { %v782_v26 = vadd.f32 %v778_v24, %v1750_v34 }
  0xeb   : > { %v785_v27 = vpack.c.bf16 %v782_v26, %v781_v25 }
 0x150   : > { %v559_v28 = vpop.f32.mrf.mxu0 }
 0x151   : > { %v569_v29 = vpack.c.bf16 %v559_v28, %v559_v28 }
 0x153   : > { %v585_v33 = vunpack.c.l.b16 %v569_v29 }
 0x158   : > { %v561_v30 = vpop.f32.mrf.mxu0 }
 0x159   : > { %v570_v31 = vpack.c.bf16 %v561_v30, %v561_v30 }
 0x15b   : > { %v586_v35 = vunpack.c.l.b16 %v570_v31 }
 0x15d   : > { %v587_v38 = vpack.c.b16 %v586_v35, %v585_v33 }
 0x15f   : > { %602 = vmatpush.bf16.msra.mxu1 %v587_v38  ;;  %1190 = vmatpush.bf16.msra.mxu3 %v587_v38 }
 0x162   : > { %1151 = vmatmul.msk.bf16.vlgmr.msra.gmra.mxu3 %vm543_vm0, %v1184_v16  ;;  %1150 = vmatmul.msk.bf16.vlgmr.msra.gmra.mxu1 %vm543_vm0, %v1183_v22 }
 0x163   : > { %800 = vmatpush.bf16.msrb.mxu3 %v1734_v18  ;;  %v564_v32 = vpop.f32.mrf.mxu2 }
 0x164   : > { %v571_v34 = vpack.c.bf16 %v564_v32, %v564_v32 }
 0x166   : > { %v646_v40 = vunpack.c.l.b16 %v571_v34 }
 0x16b   : > { %v566_v39 = vpop.f32.mrf.mxu2 }
 0x16c   : > { %v572_v41 = vpack.c.bf16 %v566_v39, %v566_v39 }
 0x16e   : > { %v647_v42 = vunpack.c.l.b16 %v572_v41 }
 0x170   : > { %v648_v43 = vpack.c.b16 %v647_v42, %v646_v40 }
 0x172   : > { %1158 = vmatmul.msk.bf16.vlgmr.msrb.gmra.mxu3 %vm543_vm0, %v785_v27  ;;  %657 = vmatpush.bf16.msrb.mxu2 %v648_v43 }
 0x175   : > { %1152 = vmatmul.msk.bf16.vlgmr.msrb.gmra.mxu2 %vm543_vm0, %v1183_v22 }
 0x182   : > { %1159 = vmatmul.msk.bf16.gmra.mxu3 %vm543_vm0, %v786_v61 }
 0x185   : > { %1153 = vmatmul.msk.bf16.gmra.mxu2 %vm543_vm0, %v1184_v16 }
 0x1df   : > { %v604_v63 = vpop.f32.mrf.mxu1 }
 0x1e5   : > { %v609_v18 = vpop.f32.mrf.mxu3 }
 0x1e6   : > { %626 = vrot.lane.b32.xlu2 %v609_v18, %s1565_s15 }
 0x1e7   : > { %v606_v1 = vpop.f32.mrf.mxu1 }
 0x1ed   : > { %v611_v44 = vpop.f32.mrf.mxu3 }
 0x1ee   : > { %628 = vrot.lane.b32.xlu0 %v611_v44, %s1565_s15 }
 0x1f5   : > { %v802_v45 = vpop.f32.mrf.mxu3 }
 0x1f6   : > { %v812_v46 = vpack.c.bf16 %v802_v45, %v802_v45 }
 0x1f8   : > { %v818_v49 = vunpack.c.l.b16 %v812_v46  ;;  %v1788_v51 = vpop.f32.mrf.mxu2 }
 0x1fd   : > { %v804_v47 = vpop.f32.mrf.mxu3 }
 0x1fe   : > { %v813_v48 = vpack.c.bf16 %v804_v47, %v804_v47 }
 0x200   : > { %v819_v50 = vunpack.c.l.b16 %v813_v48  ;;  %v1791_v54 = vpop.f32.mrf.mxu2 }
 0x202   : > { %v820_v52 = vpack.c.b16 %v819_v50, %v818_v49 }
 0x204   : > { %829 = vmatpush.bf16.msrb.mxu0 %v820_v52 }
 0x205   : > { %v807_v53 = vpop.f32.mrf.mxu3 }
 0x206   : > { %v814_v55 = vpack.c.bf16 %v807_v53, %v807_v53 }
 0x207   : > { %1160 = vmatmul.msk.bf16.vlgmr.msrb.gmra.mxu0 %vm543_vm0, %v1183_v22 }
 0x208   : > { %v875_v58 = vunpack.c.l.b16 %v814_v55  ;;  %v664_v60 = vpop.f32.mrf.mxu2 }
 0x209   : > { %682 = vrot.lane.b32.xlu1 %v664_v60, %s1565_s15 }
 0x20d   : > { %v809_v56 = vpop.f32.mrf.mxu3 }
 0x20e   : > { %v815_v57 = vpack.c.bf16 %v809_v56, %v809_v56 }
 0x210   : > { %v876_v59 = vunpack.c.l.b16 %v815_v57  ;;  %v666_v62 = vpop.f32.mrf.mxu2 }
 0x211   : > { %684 = vrot.lane.b32.xlu2 %v666_v62, %s1565_s15 }
 0x212   : > { %v877_v61 = vpack.c.b16 %v876_v59, %v875_v58 }
 0x214   : > { %886 = vmatpush.bf16.msrb.mxu1 %v877_v61 }
 0x217   : > { %1161 = vmatmul.msk.bf16.gmra.mxu0 %vm543_vm0, %v1184_v16  ;;  %1166 = vmatmul.msk.bf16.vlgmr.msrb.gmra.mxu1 %vm543_vm0, %v1183_v22 }
 0x227   : > { %1167 = vmatmul.msk.bf16.gmra.mxu1 %vm543_vm0, %v1184_v16 }
 0x240   : > { %v627_v13 = vpop.permute.xlu2 %626 }
 0x241   : > { %v632_v14 = vadd.f32 %v627_v13, %v604_v63 }
 0x260   : > { %v629_v9 = vpop.permute.xlu0 %628 }
 0x261   : > { %v633_v11 = vadd.f32 %v629_v9, %v606_v1 }
 0x26b   : > { %v685_v15 = vpop.permute.xlu2 %684 }
 0x26c   : > { %v689_v17 = vadd.f32 %v685_v15, %v1791_v54 }
 0x27b   : > { %v683_v10 = vpop.permute.xlu1 %682 }
 0x27c   : > { %v688_v12 = vadd.f32 %v683_v10, %v1788_v51 }
 0x284   : > { %v831_v0 = vpop.f32.mrf.mxu0 }
 0x28c   : > { %v1798_v2 = vpop.f32.mrf.mxu0 }
 0x294   : > { %v836_v3 = vpop.f32.mrf.mxu0  ;;  %v1800_v4 = vpop.f32.mrf.mxu1 }
 0x295   : > { %854 = vrot.lane.b32.xlu0 %v836_v3, %s1565_s15 }
 0x29c   : > { %v838_v5 = vpop.f32.mrf.mxu0  ;;  %v890_v6 = vpop.f32.mrf.mxu1 }
 0x29d   : > { %856 = vrot.lane.b32.xlu1 %v838_v5, %s1565_s15 }
 0x2a4   : > { %v893_v7 = vpop.f32.mrf.mxu1 }
 0x2a5   : > { %616 = vrot.lane.b32.xlu1 %v609_v18, %s1566_s18  ;;  %911 = vrot.lane.b32.xlu2 %v893_v7, %s1565_s15 }
 0x2ac   : > { %v895_v8 = vpop.f32.mrf.mxu1 }
 0x2ad   : > { %673 = vrot.lane.b32.xlu1 %v666_v62, %s1566_s18  ;;  %618 = vrot.lane.b32.xlu2 %v611_v44, %s1566_s18 }
 0x2ae   : > { %913 = vrot.lane.b32.xlu0 %v895_v8, %s1565_s15  ;;  %s1468_s15 = scalar_lea.hbm %s1936_s8, 128 }
 0x2af   : > { %p1470_p4 = scmp.lt.s32.totalorder %s1468_s15, %s1464_s3 }
 0x2b1   : > { %p1471_p7 = por %p1470_p4, %p1469_p3 }
 0x2b3   : > { %p1472_p8 = pnand %p1471_p7, %p1467_p2 }
 0x2b5   : > { %900 = vrot.lane.b32.xlu1 %v893_v7, %s1566_s18  ;;  %843 = vrot.lane.b32.xlu2 %v836_v3, %s1566_s18 }
 0x2b6   : > { %671 = vrot.lane.b32.xlu0 %v664_v60, %s1566_s18 }
 0x2bd   : > { %692 = vrot.lane.b32.xlu2 %v688_v12, %s1566_s18  ;;  %638 = vrot.lane.b32.xlu1 %v633_v11, %s1566_s18 }
 0x2be   : > { %845 = vrot.lane.b32.xlu0 %v838_v5, %s1566_s18 }
 0x2c5   : > { %902 = vrot.lane.b32.xlu2 %v895_v8, %s1566_s18 }
 0x2c6   : > { %636 = vrot.lane.b32.xlu0 %v632_v14, %s1566_s18 }
 0x2ce   : > { %694 = vrot.lane.b32.xlu0 %v689_v17, %s1566_s18 }
 0x2ff   : > { %v912_v19 = vpop.permute.xlu2 %911 }
 0x300   : > { %v917_v20 = vadd.f32 %v912_v19, %v1800_v4 }
 0x302   : > { %921 = vrot.lane.b32.xlu0 %v917_v20, %s1566_s18 }
 0x307   : > { %v619_v21 = vpop.permute.xlu2 %618  ;;  %v855_v36 = vpop.permute.xlu0 %854 }
 0x308   : > { %v623_v37 = vsub.f32 %v606_v1, %v619_v21  ;;  %v860_v23 = vadd.f32 %v855_v36, %v831_v0 }
 0x30a   : > { %625 = vst.msk [vmem:[%s1826_s28 + $0x8] sm:$0xff] %vm543_vm0, %v623_v37  ;;  %864 = vrot.lane.b32.xlu1 %v860_v23, %s1566_s18 }
 0x30f   : > { %v857_v24 = vpop.permute.xlu1 %856  ;;  %v844_v25 = vpop.permute.xlu2 %843 }
 0x310   : > { %v861_v26 = vadd.f32 %v857_v24, %v1798_v2  ;;  %v849_v27 = vsub.f32 %v831_v0, %v844_v25 }
 0x312   : > { %1162 = vst.msk [vmem:[%s1826_s28 + $0x20] sm:$0xff] %vm543_vm0, %v849_v27  ;;  %866 = vrot.lane.b32.xlu2 %v861_v26, %s1566_s18 }
 0x317   : > { %v617_v28 = vpop.permute.xlu1 %616  ;;  %v693_v29 = vpop.permute.xlu2 %692 }
 0x318   : > { %v622_v30 = vsub.f32 %v604_v63, %v617_v28  ;;  %1156 = vst.msk [vmem:[%s1835_s16 + $0x10] sm:$0xff] %vm543_vm0, %v693_v29 }
 0x31a   : > { %624 = vst.msk [vmem:[%s1826_s28] sm:$0xff] %vm543_vm0, %v622_v30 }
 0x31f   : > { %v674_v31 = vpop.permute.xlu1 %673  ;;  %v903_v33 = vpop.permute.xlu2 %902 }
 0x320   : > { %v678_v35 = vsub.f32 %v1791_v54, %v674_v31  ;;  %v907_v38 = vsub.f32 %v890_v6, %v903_v33  ;;  %v914_v16 = vpop.permute.xlu0 %913 }
 0x321   : > { %v918_v22 = vadd.f32 %v914_v16, %v890_v6 }
 0x322   : > { %1155 = vst.msk [vmem:[%s1826_s28 + $0x18] sm:$0xff] %vm543_vm0, %v678_v35 }
 0x323   : > { %1169 = vst.msk [vmem:[%s1826_s28 + $0x38] sm:$0xff] %vm543_vm0, %v907_v38  ;;  %923 = vrot.lane.b32.xlu1 %v918_v22, %s1566_s18 }
 0x327   : > { %v901_v32 = vpop.permute.xlu1 %900 }
 0x328   : > { %v906_v34 = vsub.f32 %v1800_v4, %v901_v32  ;;  %v672_v39 = vpop.permute.xlu0 %671 }
 0x329   : > { %v677_v40 = vsub.f32 %v1788_v51, %v672_v39 }
 0x32a   : > { %1168 = vst.msk [vmem:[%s1826_s28 + $0x30] sm:$0xff] %vm543_vm0, %v906_v34 }
 0x32b   : > { %1154 = vst.msk [vmem:[%s1826_s28 + $0x10] sm:$0xff] %vm543_vm0, %v677_v40 }
 0x32f   : > { %v639_v41 = vpop.permute.xlu1 %638 }
 0x330   : > { %643 = vst.msk [vmem:[%s1835_s16 + $0x8] sm:$0xff] %vm543_vm0, %v639_v41  ;;  %v846_v42 = vpop.permute.xlu0 %845 }
 0x331   : > { %v850_v43 = vsub.f32 %v1798_v2, %v846_v42 }
 0x333   : > { %1163 = vst.msk [vmem:[%s1826_s28 + $0x28] sm:$0xff] %vm543_vm0, %v850_v43 }
 0x334   : > { %1475 = shalt.err (!%p1472_p8)
}
 0x335   : > { %s1567_s28 = smov 128   ;;  %s1568_s23 = smov 8  }
 0x336   : > { %1207 = dma.vmem_to_hbm [thread:$0]  (%p1657_p5), %s950_s24, 1024, %s952_s14, %s931_s22, %s1567_s28, %s1567_s28, %s1568_s23  }
 0x337   : > { %s966_s24 = scalar_lea.hbm %s1937_s9, %s1186_s17  ;;  %s967_s14 = sshll.u32 %s1835_s16, 4  ;;  %s968_s14 = int_to_ptr.vmem [resolvable:$true] %s967_s14 }
 0x338   : > { %v637_v18 = vpop.permute.xlu0 %636  ;;  %s969_s22 = sshll.u32 %s966_s24, 4  ;;  %s936_s25 = scalar_lea.sflag [#allocation12], %s1822_s21  ;;  %s970_s22 = int_to_ptr.hbm [resolvable:$true] %s969_s22 }
 0x339   : > { %642 = vst.msk [vmem:[%s1835_s16] sm:$0xff] %vm543_vm0, %v637_v18  ;;  %s1490_s3 = sshra.s32 %s970_s22, 4  ;;  %s1496_s15 = scalar_lea.hbm %s1937_s9, 128  ;;  %s1491_s3 = int_to_ptr.hbm [resolvable:$true] %s1490_s3 }
 0x33a   : > { %s1492_s4 = scalar_lea.hbm %s1491_s3, 64  ;;  %p1497_p12 = scmp.lt.s32.totalorder %s1491_s3, %s1937_s9 }
 0x33b   : > { %p1493_p9 = scmp.ne.s32.totalorder %s1491_s3, %s1492_s4  ;;  %p1498_p13 = scmp.lt.s32.totalorder %s1496_s15, %s1492_s4 }
 0x33d   : > { %p1494_p10 = pnand %p1493_p9, %p1657_p5  ;;  %p1499_p0 = por %p1498_p13, %p1497_p12 }
 0x33f   : > { %p1495_p11 = pneg %p1494_p10 }
 0x340   : > { %v695_v44 = vpop.permute.xlu0 %694 }
 0x341   : > { %1157 = vst.msk [vmem:[%s1835_s16 + $0x18] sm:$0xff] %vm543_vm0, %v695_v44  ;;  %p1500_p1 = pnand %p1499_p0, %p1495_p11 }
 0x36c   : > { %v867_v45 = vpop.permute.xlu2 %866 }
 0x36d   : > { %1165 = vst.msk [vmem:[%s1835_s16 + $0x28] sm:$0xff] %vm543_vm0, %v867_v45 }
 0x374   : > { %v922_v46 = vpop.permute.xlu0 %921 }
 0x375   : > { %1170 = vst.msk [vmem:[%s1835_s16 + $0x30] sm:$0xff] %vm543_vm0, %v922_v46 }
 0x37c   : > { %v865_v47 = vpop.permute.xlu1 %864 }
 0x37d   : > { %1164 = vst.msk [vmem:[%s1835_s16 + $0x20] sm:$0xff] %vm543_vm0, %v865_v47 }
 0x395   : > { %v924_v48 = vpop.permute.xlu1 %923 }
 0x396   : > { %1171 = vst.msk [vmem:[%s1835_s16 + $0x38] sm:$0xff] %vm543_vm0, %v924_v48 }
 0x397   : > { %1503 = shalt.err (!%p1500_p1)
}
 0x398   : > { %1208 = dma.vmem_to_hbm [thread:$0]  (%p1657_p5), %s968_s14, 1024, %s970_s22, %s936_s25, %s1567_s28, %s1567_s28, %s1568_s23  }
 0x399 PF: > { %p1239_p2 = scmp.ge.s32.totalorder %s1554_s12, 2  ;;  %s984_s21 = sand.u32 1, %s1542_s30  }
 0x39a   : > { %s985_s16 = scalar_lea.sflag [#allocation4], %s984_s21 }
 0x39b   : > { %p1225_p3 = pnand %p1239_p2, %p1661_p6 }
 0x39d   : > { %p1226_p4 = pneg %p1225_p3 }
 0x39f   : > { %1533 = dma.done.wait (%p1226_p4), %s985_s16, 1024  }
 0x3a0   : > { %1535 = vsyncadd (%p1226_p4), %s985_s16, 4294966272  ;;  %s995_s27 = scalar_lea.sflag [#allocation12], %s984_s21 }
 0x3a1   : > { %1537 = dma.done.wait (%p1226_p4), %s995_s27, 1024  }
 0x3a2   : > { %1539 = vsyncadd (%p1226_p4), %s995_s27, 4294966272  ;;  %s1952_s12 = sld [smem:[#allocation19_spill]]  ;;  %s1955_s30 = smov %s1546_s10 }
 0x3a3   : > { %s1953_s19 = sld [smem:[#allocation18_spill]] }
 0x3a4   : > { %s1954_s11 = sld [smem:[#allocation20_spill]] }
 0x3a8   : > { %p26_p5 = scmp.ge.s32.totalorder %s1952_s12, 4  }
 0x3a9   : > { %s1956_s10 = smov %s1953_s19 }
 0x3aa   :  { %28 = sbr.rel (!%p26_p5) target bundleno = 11 (0xb), region = 131 }
 0x3af   :  { %1001 = vsyncpa [#allocation3], 1 }
 0x3b0   :  { %1003 = vsyncpa [#allocation3 + $0x1], 1 }
 0x3b1   :  { %1004 = vsyncpa [#allocation6], 1 }
 0x3b2   :  { %1005 = vsyncpa [#allocation9], 1 }
 0x3b3   :  { %1006 = vsyncpa [#allocation4], 1 }
 0x3b4   :  { %1008 = vsyncpa [#allocation4 + $0x1], 1 }
 0x3b5   :  { %1009 = vsyncpa [#allocation12], 1 }
 0x3b6   :  { %1011 = vsyncpa [#allocation12 + $0x1], 1 }

</bundles_post_ra>
